<compile_context>
chip_gen: v7x
topology: tpu7x:2x2x1
jax: 0.10.0
libtpu: 0.0.40
codegen_flags: <defaults>
</compile_context>

<pallas_src>
import math

import jax
import jax.numpy as jnp
from jax import lax
from jax.experimental import pallas as pl
from jax.experimental.pallas import tpu as pltpu

EPS = 1e-5  # nn.LayerNorm default eps

_TRANS_B = (((1,), (1,)), ((), ()))   # contract last dims of both operands


# --------------------------------- kernels --------------------------------- #

def self_attn_block_kernel(x_ref, g_ref, beta_ref, wqkv_ref, bqkv_ref,
                           wo_ref, bo_ref, gmat_ref, gmatT_ref,
                           o_ref, q_s, k_s, v_s):
    """x1 = x + OutProj(MHA(LN(x))).

    Block layout [B, tn, C]: B is the attention (sequence) axis of PyTorch's
    nn.MultiheadAttention with batch_first=False; the tn rows are independent
    attention problems.  Heads are reduced/broadcast with a 0/1 grouping
    matrix so the whole core is 2-D bf16 MXU matmuls with f32 accumulation.
    1/sqrt(head_dim) is pre-folded into the q columns of wqkv/bqkv.
    """
    B = x_ref.shape[0]
    C = x_ref.shape[2]
    g = g_ref[...]
    beta = beta_ref[...]
    wqkv = wqkv_ref[...]      # bf16 [C, 3C]
    bqkv = bqkv_ref[...]      # f32  [1, 3C]
    gmat = gmat_ref[...]      # bf16 0/1 [C, H] head membership
    gmatT = gmatT_ref[...]    # bf16 0/1 [H, C]

    # Pass 1: LayerNorm + fused QKV projection (one MXU op per b); results go
    # to VMEM scratch so the attention pass doesn't keep 3*B tiles in vregs.
    for b in range(B):
        xb = x_ref[b]
        mu = jnp.mean(xb, axis=-1, keepdims=True)
        var = jnp.mean(jnp.square(xb - mu), axis=-1, keepdims=True)
        hb = ((xb - mu) * lax.rsqrt(var + EPS) * g + beta).astype(jnp.bfloat16)
        qkv = jnp.dot(hb, wqkv, preferred_element_type=jnp.float32) + bqkv
        q_s[b] = qkv[:, 0:C]
        k_s[b] = qkv[:, C:2 * C]
        v_s[b] = qkv[:, 2 * C:3 * C]

    # Pass 2: per-row multi-head attention over the B axis, processed per b so
    # only B [tn, H] score tiles are live at once.
    for b in range(B):
        qb = q_s[b]
        scs = []
        for c in range(B):
            scs.append(jnp.dot((qb * k_s[c]).astype(jnp.bfloat16), gmat,
                               preferred_element_type=jnp.float32))   # [tn, H]
        m = scs[0]
        for c in range(1, B):
            m = jnp.maximum(m, scs[c])
        ps = [jnp.exp(scs[c] - m) for c in range(B)]
        denom = ps[0]
        for c in range(1, B):
            denom = denom + ps[c]
        inv = pl.reciprocal(denom, approx=True)                       # EUP slot
        acc = None
        for c in range(B):
            w_c = jnp.dot((ps[c] * inv).astype(jnp.bfloat16), gmatT,
                          preferred_element_type=jnp.float32)         # [tn, C]
            term = w_c * v_s[c]
            acc = term if acc is None else acc + term
        sa = jnp.dot(acc.astype(jnp.bfloat16), wo_ref[...],
                     preferred_element_type=jnp.float32) + bo_ref[...]
        o_ref[b] = x_ref[b] + sa          # re-read x block (already in VMEM)


def cross_ffn_kernel(x1_ref, ctx_ref, g_ref, beta_ref, wq_ref, bq_ref,
                     wkv_ref, bkv_ref, w1_ref, b1_ref, w2_ref, b2_ref, o_ref):
    """Per (batch, query-row-tile) block: cross-attention + residual + FFN.

    x2  = x1 + softmax((LN(x1) Wq) Kᵀ) V       (C**-0.5 folded into Wq/bq)
    out = x2 + W2 ReLU(W1 LN(x2))
    Context (the K/V source) is resident per batch element; the fused [2C, 2C]
    K/V projection is recomputed per query tile (cheap relative to attention).
    """
    C = x1_ref.shape[-1]
    x1 = x1_ref[...]                      # [tq, C] f32
    g = g_ref[...]
    beta = beta_ref[...]

    # LN + q projection for this row tile (bf16 MXU operands, f32 accumulate).
    mu = jnp.mean(x1, axis=-1, keepdims=True)
    var = jnp.mean(jnp.square(x1 - mu), axis=-1, keepdims=True)
    h = ((x1 - mu) * lax.rsqrt(var + EPS) * g + beta).astype(jnp.bfloat16)
    q = jnp.dot(h, wq_ref[...], preferred_element_type=jnp.float32) + bq_ref[...]

    # fused K/V projection from the (bf16) context.
    kv = jnp.dot(ctx_ref[...], wkv_ref[...],
                 preferred_element_type=jnp.float32) + bkv_ref[...]   # [N, 2C]
    k = kv[:, 0:C]
    v = kv[:, C:2 * C]

    s = lax.dot_general(q.astype(jnp.bfloat16), k.astype(jnp.bfloat16),
                        _TRANS_B, preferred_element_type=jnp.float32)  # [tq, N]
    m = jnp.max(s, axis=-1, keepdims=True)
    p = jnp.exp(s - m)
    p = p * pl.reciprocal(jnp.sum(p, axis=-1, keepdims=True), approx=True)
    attn = jnp.dot(p.astype(jnp.bfloat16), v.astype(jnp.bfloat16),
                   preferred_element_type=jnp.float32)                 # [tq, C]
    x2 = attn + x1

    # feed-forward on the same row tile.
    mu2 = jnp.mean(x2, axis=-1, keepdims=True)
    var2 = jnp.mean(jnp.square(x2 - mu2), axis=-1, keepdims=True)
    h2 = ((x2 - mu2) * lax.rsqrt(var2 + EPS) * g + beta).astype(jnp.bfloat16)
    h1 = jnp.maximum(
        jnp.dot(h2, w1_ref[...], preferred_element_type=jnp.float32)
        + b1_ref[...], 0.0)
    out = x2 + jnp.dot(h1.astype(jnp.bfloat16), w2_ref[...],
                       preferred_element_type=jnp.float32) + b2_ref[...]
    o_ref[...] = out


# ------------------------------ wrapper / glue ------------------------------ #

def _vmem_limit_bytes():
    """~75% of physical VMEM; conservative 48 MiB fallback (fits v5e/v6e/v7x)."""
    try:
        return int(pltpu.get_tpu_info().vmem_capacity_bytes * 3 // 4)
    except Exception:
        return 48 * 1024 * 1024


def _pick_row_tile(n_rows, per_row_bytes, budget_bytes, min_steps=2):
    """Largest row tile dividing n_rows that fits the VMEM budget, preferring
    >= min_steps grid steps (v7x megacore / pipelining) and 256/128 alignment
    (v6e/v7x 2x256 MXU)."""
    if n_rows <= 8:
        return max(n_rows, 1)
    cands = [t for t in range(8, n_rows + 1, 8) if n_rows % t == 0]
    if n_rows not in cands:
        cands.append(n_rows)
    fit = [t for t in cands if t * per_row_bytes <= budget_bytes] or [min(cands)]
    multi = [t for t in fit if n_rows // t >= min_steps] or fit
    return max(multi, key=lambda t: (t % 256 == 0, t % 128 == 0, t))


def _const_index_map(ndim):
    return lambda *_: (0,) * ndim


def _weight_spec(w, single_buffer):
    """Resident (grid-invariant) weight spec; optionally single-buffered."""
    if single_buffer:
        return pl.BlockSpec(w.shape, _const_index_map(w.ndim),
                            pipeline_mode=pl.Buffered(1))
    return pl.BlockSpec(w.shape, _const_index_map(w.ndim))


def _with_weight_buffer_fallback(call):
    """Try single-buffered resident weights (frees VMEM, esp. on v7x); fall
    back to default double-buffering if this JAX/Mosaic build rejects it."""
    if hasattr(pl, "Buffered"):
        try:
            return jax.block_until_ready(call(True))
        except Exception:
            pass
    return call(False)


def prepare_params(p, num_heads):
    """One-time weight prep: transpose, fuse QKV / KV, fold scales, cast MXU
    operands to bf16 (hoisted out of the forward pass)."""
    C = p["ln_g"].shape[0]
    H = num_heads
    assert C % H == 0
    Dh = C // H
    bf, f32 = jnp.bfloat16, jnp.float32
    sm_scale = 1.0 / math.sqrt(Dh)
    cross_scale = C ** (-0.5)

    wq_s, wk_s, wv_s = jnp.split(p["in_proj_w"], 3, axis=0)    # each (C, C)
    bq_s, bk_s, bv_s = jnp.split(p["in_proj_b"], 3)
    wk_x, wv_x = jnp.split(p["to_kv_w"], 2, axis=0)            # each (C, 2C)
    bk_x, bv_x = jnp.split(p["to_kv_b"], 2)

    head_ids = jnp.arange(C) // Dh
    gmat = (head_ids[:, None] == jnp.arange(H)[None, :]).astype(f32)  # (C, H)

    wqkv = jnp.concatenate([wq_s.T * sm_scale, wk_s.T, wv_s.T], axis=1)      # (C, 3C)
    bqkv = jnp.concatenate([bq_s * sm_scale, bk_s, bv_s]).reshape(1, 3 * C)
    wkv_x = jnp.concatenate([wk_x.T, wv_x.T], axis=1)                        # (2C, 2C)
    bkv_x = jnp.concatenate([bk_x, bv_x]).reshape(1, 2 * C)

    return dict(
        ln_g=p["ln_g"].reshape(1, C).astype(f32),
        ln_b=p["ln_b"].reshape(1, C).astype(f32),
        # self-attention (1/sqrt(Dh) folded into the q columns)
        wqkv_self=wqkv.astype(bf), bqkv_self=bqkv.astype(f32),
        wo=p["out_proj_w"].T.astype(bf),
        bo=p["out_proj_b"].reshape(1, C).astype(f32),
        gmat=gmat.astype(bf), gmat_t=gmat.T.astype(bf),
        # cross-attention (C**-0.5 folded into q projection), fused K/V proj
        wq_cross=(p["to_q_w"].T * cross_scale).astype(bf),
        bq_cross=(p["to_q_b"] * cross_scale).reshape(1, C).astype(f32),
        wkv_cross=wkv_x.astype(bf), bkv_cross=bkv_x.astype(f32),
        # feed-forward
        w1=p["ff1_w"].T.astype(bf), b1=p["ff1_b"].reshape(1, 4 * C).astype(f32),
        w2=p["ff2_w"].T.astype(bf), b2=p["ff2_b"].reshape(1, C).astype(f32),
        num_heads=H,
    )


def _run_kernel_a(x, pp, tn, vmem_limit, single_buffer):
    B, N, C = x.shape
    weights = (pp["ln_g"], pp["ln_b"], pp["wqkv_self"], pp["bqkv_self"],
               pp["wo"], pp["bo"], pp["gmat"], pp["gmat_t"])
    return pl.pallas_call(
        self_attn_block_kernel,
        grid=(N // tn,),
        in_specs=[pl.BlockSpec((B, tn, C), lambda i: (0, i, 0))]
                 + [_weight_spec(w, single_buffer) for w in weights],
        out_specs=pl.BlockSpec((B, tn, C), lambda i: (0, i, 0)),
        out_shape=jax.ShapeDtypeStruct((B, N, C), jnp.float32),
        scratch_shapes=[pltpu.VMEM((B, tn, C), jnp.float32)] * 3,
        compiler_params=pltpu.CompilerParams(
            dimension_semantics=("parallel",),
            vmem_limit_bytes=vmem_limit),
    )(x, *weights)


def _run_kernel_b(x1, ctx, pp, tq, vmem_limit, single_buffer):
    B, N, C = x1.shape
    weights = (pp["ln_g"], pp["ln_b"], pp["wq_cross"], pp["bq_cross"],
               pp["wkv_cross"], pp["bkv_cross"],
               pp["w1"], pp["b1"], pp["w2"], pp["b2"])
    return pl.pallas_call(
        cross_ffn_kernel,
        grid=(B, N // tq),
        in_specs=[pl.BlockSpec((None, tq, C), lambda b, q: (b, q, 0)),
                  pl.BlockSpec((None, N, 2 * C), lambda b, q: (b, 0, 0))]
                 + [_weight_spec(w, single_buffer) for w in weights],
        out_specs=pl.BlockSpec((None, tq, C), lambda b, q: (b, q, 0)),
        out_shape=jax.ShapeDtypeStruct((B, N, C), jnp.float32),
        compiler_params=pltpu.CompilerParams(
            dimension_semantics=("parallel", "parallel"),
            vmem_limit_bytes=vmem_limit),
    )(x1, ctx, *weights)


def transformer_cross_block(x, context, pp):
    """x: [B, N, C] f32, context: [B, N, 2C] f32, pp: prepare_params output."""
    B, N, C = x.shape
    vlim = _vmem_limit_bytes()
    block_budget = 16 * 1024 * 1024   # VMEM budget for pipelined data blocks

    # kernel A: bytes per N-row = double-buffered in+out blocks + q/k/v scratch
    # (plus ~2x fudge for in-kernel temporaries).
    per_row_a = 2 * (2 + 2 + 3) * B * C * 4
    tn = _pick_row_tile(N, per_row_a, block_budget)
    x1 = _with_weight_buffer_fallback(
        lambda sb: _run_kernel_a(x, pp, tn, vlim, sb))

    # kernel B: per query-row = double-buffered in/out rows + [tq, N] score
    # tile + [tq, 4C] FFN activation (approx); context block is resident.
    ctx_resident = 2 * N * 2 * C * 2          # double-buffered bf16 [N, 2C]
    per_row_b = 16 * C + 6 * N + 40 * C
    tq = _pick_row_tile(N, per_row_b,
                        max(block_budget - ctx_resident, 1 << 20))
    ctx_bf16 = context.astype(jnp.bfloat16)   # only ever an MXU operand
    out = _with_weight_buffer_fallback(
        lambda sb: _run_kernel_b(x1, ctx_bf16, pp, tq, vlim, sb))
    return out


# ------------------------------ pure-JAX reference -------------------------- #

def _ln(x, g, b):
    mu = jnp.mean(x, -1, keepdims=True)
    var = jnp.mean(jnp.square(x - mu), -1, keepdims=True)
    return (x - mu) / jnp.sqrt(var + EPS) * g + b


def reference_forward(x, context, p, *, num_heads):
    B, N, C = x.shape
    H, Dh = num_heads, C // num_heads
    g, be = p["ln_g"], p["ln_b"]
    # self attention (PyTorch MHA, batch_first=False => seq axis is B)
    h = _ln(x, g, be)
    qkv = h @ p["in_proj_w"].T + p["in_proj_b"]
    q, k, v = jnp.split(qkv, 3, axis=-1)
    q, k, v = (t.reshape(B, N, H, Dh) for t in (q, k, v))
    s = jnp.einsum("bnhd,cnhd->nhbc", q, k) / math.sqrt(Dh)
    a = jax.nn.softmax(s, axis=-1)
    sa = jnp.einsum("nhbc,cnhd->bnhd", a, v).reshape(B, N, C)
    sa = sa @ p["out_proj_w"].T + p["out_proj_b"]
    x1 = x + sa
    # cross attention
    h2 = _ln(x1, g, be)
    qc = h2 @ p["to_q_w"].T + p["to_q_b"]
    kv = context @ p["to_kv_w"].T + p["to_kv_b"]
    kc, vc = jnp.split(kv, 2, axis=-1)
    attn = jax.nn.softmax(jnp.einsum("bqc,bkc->bqk", qc, kc) * (C ** -0.5), -1)
    x2 = jnp.einsum("bqk,bkc->bqc", attn, vc) + x1
    # feed forward
    h3 = _ln(x2, g, be)
    ff = jnp.maximum(h3 @ p["ff1_w"].T + p["ff1_b"], 0.0) @ p["ff2_w"].T + p["ff2_b"]
    return x2 + ff


# ------------------------------ params / main ------------------------------- #

def init_params(key, C):
    ks = jax.random.split(key, 12)

    def w(k, shape, scale):
        return (scale * jax.random.normal(k, shape)).astype(jnp.float32)

    return dict(
        ln_g=(1.0 + 0.1 * jax.random.normal(ks[0], (C,))).astype(jnp.float32),
        ln_b=(0.1 * jax.random.normal(ks[1], (C,))).astype(jnp.float32),
        in_proj_w=w(ks[2], (3 * C, C), C ** -0.5),
        in_proj_b=w(ks[3], (3 * C,), 0.02),
        out_proj_w=w(ks[4], (C, C), C ** -0.5),
        out_proj_b=w(ks[5], (C,), 0.02),
        to_q_w=w(ks[6], (C, C), C ** -0.5),
        to_q_b=w(ks[7], (C,), 0.02),
        to_kv_w=w(ks[8], (2 * C, 2 * C), (2 * C) ** -0.5),
        to_kv_b=w(ks[9], (2 * C,), 0.02),
        ff1_w=w(ks[10], (4 * C, C), C ** -0.5),
        ff1_b=jnp.zeros((4 * C,), jnp.float32),
        ff2_w=w(ks[11], (C, 4 * C), (4 * C) ** -0.5),
        ff2_b=jnp.zeros((C,), jnp.float32),
    )


if __name__ == "__main__":
    B, N, C, H = 2, 8, 32, 4           # hidden_dim=32, num_heads=4
    key = jax.random.PRNGKey(0)
    kx, kc, kp = jax.random.split(key, 3)
    x = jax.random.normal(kx, (B, N, C), jnp.float32)
    context = jax.random.normal(kc, (B, N, 2 * C), jnp.float32)
    raw_params = init_params(kp, C)
    params = prepare_params(raw_params, num_heads=H)   # hoisted, one-time prep

    out = transformer_cross_block(x, context, params)
    out = jax.block_until_ready(out)
    assert out.shape == (B, N, C)

    ref = reference_forward(x, context, raw_params, num_heads=H)
    max_diff = float(jnp.max(jnp.abs(out - ref)))
    if not bool(jnp.allclose(out, ref, atol=5e-2, rtol=5e-2)):
        raise RuntimeError(
            "kernel/reference mismatch, max abs diff = %.3e" % max_diff)

    print("KERNEL_OK")
</pallas_src>

<mosaic_0001>
module attributes {stable_mosaic.version = 11 : i64} {
  func.func @self_attn_block_kernel(%arg0: i32, %arg1: memref<2x8x32xf32, #tpu.memory_space<vmem>>, %arg2: memref<1x32xf32, #tpu.memory_space<vmem>>, %arg3: memref<1x32xf32, #tpu.memory_space<vmem>>, %arg4: memref<32x96xbf16, #tpu.memory_space<vmem>>, %arg5: memref<1x96xf32, #tpu.memory_space<vmem>>, %arg6: memref<32x32xbf16, #tpu.memory_space<vmem>>, %arg7: memref<1x32xf32, #tpu.memory_space<vmem>>, %arg8: memref<32x4xbf16, #tpu.memory_space<vmem>>, %arg9: memref<4x32xbf16, #tpu.memory_space<vmem>>, %arg10: memref<2x8x32xf32, #tpu.memory_space<vmem>>, %arg11: memref<2x8x32xf32, #tpu.memory_space<vmem>>, %arg12: memref<2x8x32xf32, #tpu.memory_space<vmem>>, %arg13: memref<2x8x32xf32, #tpu.memory_space<vmem>>) attributes {dimension_semantics = [#tpu.dimension_semantics<parallel>], iteration_bounds = array<i64: 1>, scalar_prefetch = 0 : i64, scratch_operands = 3 : i64, tpu.core_type = #tpu.core_type<tc>, window_params = [{transform_indices = @transform_0, window_bounds = array<i64: 2, 8, 32>}, {pipeline_mode = #tpu.pipeline_mode<synchronous>, transform_indices = @transform_1, window_bounds = array<i64: 1, 32>}, {pipeline_mode = #tpu.pipeline_mode<synchronous>, transform_indices = @transform_2, window_bounds = array<i64: 1, 32>}, {pipeline_mode = #tpu.pipeline_mode<synchronous>, transform_indices = @transform_3, window_bounds = array<i64: 32, 96>}, {pipeline_mode = #tpu.pipeline_mode<synchronous>, transform_indices = @transform_4, window_bounds = array<i64: 1, 96>}, {pipeline_mode = #tpu.pipeline_mode<synchronous>, transform_indices = @transform_5, window_bounds = array<i64: 32, 32>}, {pipeline_mode = #tpu.pipeline_mode<synchronous>, transform_indices = @transform_6, window_bounds = array<i64: 1, 32>}, {pipeline_mode = #tpu.pipeline_mode<synchronous>, transform_indices = @transform_7, window_bounds = array<i64: 32, 4>}, {pipeline_mode = #tpu.pipeline_mode<synchronous>, transform_indices = @transform_8, window_bounds = array<i64: 4, 32>}, {transform_indices = @transform_9, window_bounds = array<i64: 2, 8, 32>}]} {
    %c0 = arith.constant 0 : index
    %c0_0 = arith.constant 0 : index
    %0 = vector.load %arg2[%c0, %c0_0] : memref<1x32xf32, #tpu.memory_space<vmem>>, vector<1x32xf32>
    %c0_1 = arith.constant 0 : index
    %c0_2 = arith.constant 0 : index
    %1 = vector.load %arg3[%c0_1, %c0_2] : memref<1x32xf32, #tpu.memory_space<vmem>>, vector<1x32xf32>
    %c0_3 = arith.constant 0 : index
    %c0_4 = arith.constant 0 : index
    %2 = vector.load %arg4[%c0_3, %c0_4] : memref<32x96xbf16, #tpu.memory_space<vmem>>, vector<32x96xbf16>
    %c0_5 = arith.constant 0 : index
    %c0_6 = arith.constant 0 : index
    %3 = vector.load %arg5[%c0_5, %c0_6] : memref<1x96xf32, #tpu.memory_space<vmem>>, vector<1x96xf32>
    %c0_7 = arith.constant 0 : index
    %c0_8 = arith.constant 0 : index
    %4 = vector.load %arg8[%c0_7, %c0_8] : memref<32x4xbf16, #tpu.memory_space<vmem>>, vector<32x4xbf16>
    %c0_9 = arith.constant 0 : index
    %c0_10 = arith.constant 0 : index
    %5 = vector.load %arg9[%c0_9, %c0_10] : memref<4x32xbf16, #tpu.memory_space<vmem>>, vector<4x32xbf16>
    %c0_11 = arith.constant 0 : index
    %c0_12 = arith.constant 0 : index
    %c0_13 = arith.constant 0 : index
    %6 = vector.load %arg1[%c0_11, %c0_12, %c0_13] : memref<2x8x32xf32, #tpu.memory_space<vmem>>, vector<1x8x32xf32>
    %7 = vector.shape_cast %6 : vector<1x8x32xf32> to vector<8x32xf32>
    %cst = arith.constant dense<0.000000e+00> : vector<8xf32>
    %8 = vector.multi_reduction <add>, %7, %cst [1] : vector<8x32xf32> to vector<8xf32>
    %9 = vector.shape_cast %8 : vector<8xf32> to vector<8x1xf32>
    %cst_14 = arith.constant 3.200000e+01 : f32
    %10 = vector.broadcast %cst_14 : f32 to vector<8x1xf32>
    %11 = arith.divf %9, %10 : vector<8x1xf32>
    %12 = vector.broadcast %11 : vector<8x1xf32> to vector<8x32xf32>
    %13 = arith.subf %7, %12 : vector<8x32xf32>
    %14 = arith.mulf %13, %13 : vector<8x32xf32>
    %cst_15 = arith.constant dense<0.000000e+00> : vector<8xf32>
    %15 = vector.multi_reduction <add>, %14, %cst_15 [1] : vector<8x32xf32> to vector<8xf32>
    %16 = vector.shape_cast %15 : vector<8xf32> to vector<8x1xf32>
    %cst_16 = arith.constant 3.200000e+01 : f32
    %17 = vector.broadcast %cst_16 : f32 to vector<8x1xf32>
    %18 = arith.divf %16, %17 : vector<8x1xf32>
    %19 = vector.broadcast %11 : vector<8x1xf32> to vector<8x32xf32>
    %20 = arith.subf %7, %19 : vector<8x32xf32>
    %cst_17 = arith.constant 9.99999974E-6 : f32
    %21 = vector.broadcast %cst_17 : f32 to vector<8x1xf32>
    %22 = arith.addf %18, %21 : vector<8x1xf32>
    %23 = math.rsqrt %22 : vector<8x1xf32>
    %24 = vector.broadcast %23 : vector<8x1xf32> to vector<8x32xf32>
    %25 = arith.mulf %20, %24 : vector<8x32xf32>
    %26 = vector.broadcast %0 : vector<1x32xf32> to vector<8x32xf32>
    %27 = arith.mulf %25, %26 : vector<8x32xf32>
    %28 = vector.broadcast %1 : vector<1x32xf32> to vector<8x32xf32>
    %29 = arith.addf %27, %28 : vector<8x32xf32>
    %30 = arith.truncf %29 : vector<8x32xf32> to vector<8x32xbf16>
    %cst_18 = arith.constant dense<0.000000e+00> : vector<8x96xf32>
    %31 = tpu.matmul %30, %2, %cst_18 {dimension_numbers = #tpu.dot_dimension_numbers<[1], [0], [0], [1], [0, 0, 1, 1], [], []>} : vector<8x32xbf16>, vector<32x96xbf16>, vector<8x96xf32> -> vector<8x96xf32>
    %32 = vector.broadcast %3 : vector<1x96xf32> to vector<8x96xf32>
    %33 = arith.addf %31, %32 : vector<8x96xf32>
    %34 = vector.extract_strided_slice %33 {offsets = [0, 0], sizes = [8, 32], strides = [1, 1]} : vector<8x96xf32> to vector<8x32xf32>
    %c0_19 = arith.constant 0 : index
    %c0_20 = arith.constant 0 : index
    %c0_21 = arith.constant 0 : index
    %35 = vector.load %arg11[%c0_19, %c0_20, %c0_21] : memref<2x8x32xf32, #tpu.memory_space<vmem>>, vector<1x8x32xf32>
    %36 = vector.shape_cast %35 : vector<1x8x32xf32> to vector<8x32xf32>
    %37 = vector.shape_cast %34 : vector<8x32xf32> to vector<1x8x32xf32>
    tpu.vector_store %arg11[%c0_19, %c0_20, %c0_21], %37 {strides = array<i32>} : memref<2x8x32xf32, #tpu.memory_space<vmem>>, vector<1x8x32xf32>,
    %38 = vector.extract_strided_slice %33 {offsets = [0, 32], sizes = [8, 32], strides = [1, 1]} : vector<8x96xf32> to vector<8x32xf32>
    %c0_22 = arith.constant 0 : index
    %c0_23 = arith.constant 0 : index
    %c0_24 = arith.constant 0 : index
    %39 = vector.load %arg12[%c0_22, %c0_23, %c0_24] : memref<2x8x32xf32, #tpu.memory_space<vmem>>, vector<1x8x32xf32>
    %40 = vector.shape_cast %39 : vector<1x8x32xf32> to vector<8x32xf32>
    %41 = vector.shape_cast %38 : vector<8x32xf32> to vector<1x8x32xf32>
    tpu.vector_store %arg12[%c0_22, %c0_23, %c0_24], %41 {strides = array<i32>} : memref<2x8x32xf32, #tpu.memory_space<vmem>>, vector<1x8x32xf32>,
    %42 = vector.extract_strided_slice %33 {offsets = [0, 64], sizes = [8, 32], strides = [1, 1]} : vector<8x96xf32> to vector<8x32xf32>
    %c0_25 = arith.constant 0 : index
    %c0_26 = arith.constant 0 : index
    %c0_27 = arith.constant 0 : index
    %43 = vector.load %arg13[%c0_25, %c0_26, %c0_27] : memref<2x8x32xf32, #tpu.memory_space<vmem>>, vector<1x8x32xf32>
    %44 = vector.shape_cast %43 : vector<1x8x32xf32> to vector<8x32xf32>
    %45 = vector.shape_cast %42 : vector<8x32xf32> to vector<1x8x32xf32>
    tpu.vector_store %arg13[%c0_25, %c0_26, %c0_27], %45 {strides = array<i32>} : memref<2x8x32xf32, #tpu.memory_space<vmem>>, vector<1x8x32xf32>,
    %c1 = arith.constant 1 : index
    %c0_28 = arith.constant 0 : index
    %c0_29 = arith.constant 0 : index
    %46 = vector.load %arg1[%c1, %c0_28, %c0_29] : memref<2x8x32xf32, #tpu.memory_space<vmem>>, vector<1x8x32xf32>
    %47 = vector.shape_cast %46 : vector<1x8x32xf32> to vector<8x32xf32>
    %cst_30 = arith.constant dense<0.000000e+00> : vector<8xf32>
    %48 = vector.multi_reduction <add>, %47, %cst_30 [1] : vector<8x32xf32> to vector<8xf32>
    %49 = vector.shape_cast %48 : vector<8xf32> to vector<8x1xf32>
    %cst_31 = arith.constant 3.200000e+01 : f32
    %50 = vector.broadcast %cst_31 : f32 to vector<8x1xf32>
    %51 = arith.divf %49, %50 : vector<8x1xf32>
    %52 = vector.broadcast %51 : vector<8x1xf32> to vector<8x32xf32>
    %53 = arith.subf %47, %52 : vector<8x32xf32>
    %54 = arith.mulf %53, %53 : vector<8x32xf32>
    %cst_32 = arith.constant dense<0.000000e+00> : vector<8xf32>
    %55 = vector.multi_reduction <add>, %54, %cst_32 [1] : vector<8x32xf32> to vector<8xf32>
    %56 = vector.shape_cast %55 : vector<8xf32> to vector<8x1xf32>
    %cst_33 = arith.constant 3.200000e+01 : f32
    %57 = vector.broadcast %cst_33 : f32 to vector<8x1xf32>
    %58 = arith.divf %56, %57 : vector<8x1xf32>
    %59 = vector.broadcast %51 : vector<8x1xf32> to vector<8x32xf32>
    %60 = arith.subf %47, %59 : vector<8x32xf32>
    %cst_34 = arith.constant 9.99999974E-6 : f32
    %61 = vector.broadcast %cst_34 : f32 to vector<8x1xf32>
    %62 = arith.addf %58, %61 : vector<8x1xf32>
    %63 = math.rsqrt %62 : vector<8x1xf32>
    %64 = vector.broadcast %63 : vector<8x1xf32> to vector<8x32xf32>
    %65 = arith.mulf %60, %64 : vector<8x32xf32>
    %66 = vector.broadcast %0 : vector<1x32xf32> to vector<8x32xf32>
    %67 = arith.mulf %65, %66 : vector<8x32xf32>
    %68 = vector.broadcast %1 : vector<1x32xf32> to vector<8x32xf32>
    %69 = arith.addf %67, %68 : vector<8x32xf32>
    %70 = arith.truncf %69 : vector<8x32xf32> to vector<8x32xbf16>
    %cst_35 = arith.constant dense<0.000000e+00> : vector<8x96xf32>
    %71 = tpu.matmul %70, %2, %cst_35 {dimension_numbers = #tpu.dot_dimension_numbers<[1], [0], [0], [1], [0, 0, 1, 1], [], []>} : vector<8x32xbf16>, vector<32x96xbf16>, vector<8x96xf32> -> vector<8x96xf32>
    %72 = vector.broadcast %3 : vector<1x96xf32> to vector<8x96xf32>
    %73 = arith.addf %71, %72 : vector<8x96xf32>
    %74 = vector.extract_strided_slice %73 {offsets = [0, 0], sizes = [8, 32], strides = [1, 1]} : vector<8x96xf32> to vector<8x32xf32>
    %c1_36 = arith.constant 1 : index
    %c0_37 = arith.constant 0 : index
    %c0_38 = arith.constant 0 : index
    %75 = vector.load %arg11[%c1_36, %c0_37, %c0_38] : memref<2x8x32xf32, #tpu.memory_space<vmem>>, vector<1x8x32xf32>
    %76 = vector.shape_cast %75 : vector<1x8x32xf32> to vector<8x32xf32>
    %77 = vector.shape_cast %74 : vector<8x32xf32> to vector<1x8x32xf32>
    tpu.vector_store %arg11[%c1_36, %c0_37, %c0_38], %77 {strides = array<i32>} : memref<2x8x32xf32, #tpu.memory_space<vmem>>, vector<1x8x32xf32>,
    %78 = vector.extract_strided_slice %73 {offsets = [0, 32], sizes = [8, 32], strides = [1, 1]} : vector<8x96xf32> to vector<8x32xf32>
    %c1_39 = arith.constant 1 : index
    %c0_40 = arith.constant 0 : index
    %c0_41 = arith.constant 0 : index
    %79 = vector.load %arg12[%c1_39, %c0_40, %c0_41] : memref<2x8x32xf32, #tpu.memory_space<vmem>>, vector<1x8x32xf32>
    %80 = vector.shape_cast %79 : vector<1x8x32xf32> to vector<8x32xf32>
    %81 = vector.shape_cast %78 : vector<8x32xf32> to vector<1x8x32xf32>
    tpu.vector_store %arg12[%c1_39, %c0_40, %c0_41], %81 {strides = array<i32>} : memref<2x8x32xf32, #tpu.memory_space<vmem>>, vector<1x8x32xf32>,
    %82 = vector.extract_strided_slice %73 {offsets = [0, 64], sizes = [8, 32], strides = [1, 1]} : vector<8x96xf32> to vector<8x32xf32>
    %c1_42 = arith.constant 1 : index
    %c0_43 = arith.constant 0 : index
    %c0_44 = arith.constant 0 : index
    %83 = vector.load %arg13[%c1_42, %c0_43, %c0_44] : memref<2x8x32xf32, #tpu.memory_space<vmem>>, vector<1x8x32xf32>
    %84 = vector.shape_cast %83 : vector<1x8x32xf32> to vector<8x32xf32>
    %85 = vector.shape_cast %82 : vector<8x32xf32> to vector<1x8x32xf32>
    tpu.vector_store %arg13[%c1_42, %c0_43, %c0_44], %85 {strides = array<i32>} : memref<2x8x32xf32, #tpu.memory_space<vmem>>, vector<1x8x32xf32>,
    %c0_45 = arith.constant 0 : index
    %c0_46 = arith.constant 0 : index
    %c0_47 = arith.constant 0 : index
    %86 = vector.load %arg11[%c0_45, %c0_46, %c0_47] : memref<2x8x32xf32, #tpu.memory_space<vmem>>, vector<1x8x32xf32>
    %87 = vector.shape_cast %86 : vector<1x8x32xf32> to vector<8x32xf32>
    %c0_48 = arith.constant 0 : index
    %c0_49 = arith.constant 0 : index
    %c0_50 = arith.constant 0 : index
    %88 = vector.load %arg12[%c0_48, %c0_49, %c0_50] : memref<2x8x32xf32, #tpu.memory_space<vmem>>, vector<1x8x32xf32>
    %89 = vector.shape_cast %88 : vector<1x8x32xf32> to vector<8x32xf32>
    %90 = arith.mulf %87, %89 : vector<8x32xf32>
    %91 = arith.truncf %90 : vector<8x32xf32> to vector<8x32xbf16>
    %cst_51 = arith.constant dense<0.000000e+00> : vector<8x4xf32>
    %92 = tpu.matmul %91, %4, %cst_51 {dimension_numbers = #tpu.dot_dimension_numbers<[1], [0], [0], [1], [0, 0, 1, 1], [], []>} : vector<8x32xbf16>, vector<32x4xbf16>, vector<8x4xf32> -> vector<8x4xf32>
    %c1_52 = arith.constant 1 : index
    %c0_53 = arith.constant 0 : index
    %c0_54 = arith.constant 0 : index
    %93 = vector.load %arg12[%c1_52, %c0_53, %c0_54] : memref<2x8x32xf32, #tpu.memory_space<vmem>>, vector<1x8x32xf32>
    %94 = vector.shape_cast %93 : vector<1x8x32xf32> to vector<8x32xf32>
    %95 = arith.mulf %87, %94 : vector<8x32xf32>
    %96 = arith.truncf %95 : vector<8x32xf32> to vector<8x32xbf16>
    %cst_55 = arith.constant dense<0.000000e+00> : vector<8x4xf32>
    %97 = tpu.matmul %96, %4, %cst_55 {dimension_numbers = #tpu.dot_dimension_numbers<[1], [0], [0], [1], [0, 0, 1, 1], [], []>} : vector<8x32xbf16>, vector<32x4xbf16>, vector<8x4xf32> -> vector<8x4xf32>
    %98 = arith.maximumf %92, %97 : vector<8x4xf32>
    %99 = arith.subf %92, %98 : vector<8x4xf32>
    %100 = math.exp %99 : vector<8x4xf32>
    %101 = arith.subf %97, %98 : vector<8x4xf32>
    %102 = math.exp %101 : vector<8x4xf32>
    %103 = arith.addf %100, %102 : vector<8x4xf32>
    %104 = tpu.reciprocal %103 {approx = true} : vector<8x4xf32> -> vector<8x4xf32>
    %105 = arith.mulf %100, %104 : vector<8x4xf32>
    %106 = arith.truncf %105 : vector<8x4xf32> to vector<8x4xbf16>
    %cst_56 = arith.constant dense<0.000000e+00> : vector<8x32xf32>
    %107 = tpu.matmul %106, %5, %cst_56 {dimension_numbers = #tpu.dot_dimension_numbers<[1], [0], [0], [1], [0, 0, 1, 1], [], []>} : vector<8x4xbf16>, vector<4x32xbf16>, vector<8x32xf32> -> vector<8x32xf32>
    %c0_57 = arith.constant 0 : index
    %c0_58 = arith.constant 0 : index
    %c0_59 = arith.constant 0 : index
    %108 = vector.load %arg13[%c0_57, %c0_58, %c0_59] : memref<2x8x32xf32, #tpu.memory_space<vmem>>, vector<1x8x32xf32>
    %109 = vector.shape_cast %108 : vector<1x8x32xf32> to vector<8x32xf32>
    %110 = arith.mulf %107, %109 : vector<8x32xf32>
    %111 = arith.mulf %102, %104 : vector<8x4xf32>
    %112 = arith.truncf %111 : vector<8x4xf32> to vector<8x4xbf16>
    %cst_60 = arith.constant dense<0.000000e+00> : vector<8x32xf32>
    %113 = tpu.matmul %112, %5, %cst_60 {dimension_numbers = #tpu.dot_dimension_numbers<[1], [0], [0], [1], [0, 0, 1, 1], [], []>} : vector<8x4xbf16>, vector<4x32xbf16>, vector<8x32xf32> -> vector<8x32xf32>
    %c1_61 = arith.constant 1 : index
    %c0_62 = arith.constant 0 : index
    %c0_63 = arith.constant 0 : index
    %114 = vector.load %arg13[%c1_61, %c0_62, %c0_63] : memref<2x8x32xf32, #tpu.memory_space<vmem>>, vector<1x8x32xf32>
    %115 = vector.shape_cast %114 : vector<1x8x32xf32> to vector<8x32xf32>
    %116 = arith.mulf %113, %115 : vector<8x32xf32>
    %117 = arith.addf %110, %116 : vector<8x32xf32>
    %118 = arith.truncf %117 : vector<8x32xf32> to vector<8x32xbf16>
    %c0_64 = arith.constant 0 : index
    %c0_65 = arith.constant 0 : index
    %119 = vector.load %arg6[%c0_64, %c0_65] : memref<32x32xbf16, #tpu.memory_space<vmem>>, vector<32x32xbf16>
    %cst_66 = arith.constant dense<0.000000e+00> : vector<8x32xf32>
    %120 = tpu.matmul %118, %119, %cst_66 {dimension_numbers = #tpu.dot_dimension_numbers<[1], [0], [0], [1], [0, 0, 1, 1], [], []>} : vector<8x32xbf16>, vector<32x32xbf16>, vector<8x32xf32> -> vector<8x32xf32>
    %c0_67 = arith.constant 0 : index
    %c0_68 = arith.constant 0 : index
    %121 = vector.load %arg7[%c0_67, %c0_68] : memref<1x32xf32, #tpu.memory_space<vmem>>, vector<1x32xf32>
    %122 = vector.broadcast %121 : vector<1x32xf32> to vector<8x32xf32>
    %123 = arith.addf %120, %122 : vector<8x32xf32>
    %c0_69 = arith.constant 0 : index
    %c0_70 = arith.constant 0 : index
    %c0_71 = arith.constant 0 : index
    %124 = vector.load %arg1[%c0_69, %c0_70, %c0_71] : memref<2x8x32xf32, #tpu.memory_space<vmem>>, vector<1x8x32xf32>
    %125 = vector.shape_cast %124 : vector<1x8x32xf32> to vector<8x32xf32>
    %126 = arith.addf %125, %123 : vector<8x32xf32>
    %c0_72 = arith.constant 0 : index
    %c0_73 = arith.constant 0 : index
    %c0_74 = arith.constant 0 : index
    %127 = vector.load %arg10[%c0_72, %c0_73, %c0_74] : memref<2x8x32xf32, #tpu.memory_space<vmem>>, vector<1x8x32xf32>
    %128 = vector.shape_cast %127 : vector<1x8x32xf32> to vector<8x32xf32>
    %129 = vector.shape_cast %126 : vector<8x32xf32> to vector<1x8x32xf32>
    tpu.vector_store %arg10[%c0_72, %c0_73, %c0_74], %129 {strides = array<i32>} : memref<2x8x32xf32, #tpu.memory_space<vmem>>, vector<1x8x32xf32>,
    %c1_75 = arith.constant 1 : index
    %c0_76 = arith.constant 0 : index
    %c0_77 = arith.constant 0 : index
    %130 = vector.load %arg11[%c1_75, %c0_76, %c0_77] : memref<2x8x32xf32, #tpu.memory_space<vmem>>, vector<1x8x32xf32>
    %131 = vector.shape_cast %130 : vector<1x8x32xf32> to vector<8x32xf32>
    %c0_78 = arith.constant 0 : index
    %c0_79 = arith.constant 0 : index
    %c0_80 = arith.constant 0 : index
    %132 = vector.load %arg12[%c0_78, %c0_79, %c0_80] : memref<2x8x32xf32, #tpu.memory_space<vmem>>, vector<1x8x32xf32>
    %133 = vector.shape_cast %132 : vector<1x8x32xf32> to vector<8x32xf32>
    %134 = arith.mulf %131, %133 : vector<8x32xf32>
    %135 = arith.truncf %134 : vector<8x32xf32> to vector<8x32xbf16>
    %cst_81 = arith.constant dense<0.000000e+00> : vector<8x4xf32>
    %136 = tpu.matmul %135, %4, %cst_81 {dimension_numbers = #tpu.dot_dimension_numbers<[1], [0], [0], [1], [0, 0, 1, 1], [], []>} : vector<8x32xbf16>, vector<32x4xbf16>, vector<8x4xf32> -> vector<8x4xf32>
    %c1_82 = arith.constant 1 : index
    %c0_83 = arith.constant 0 : index
    %c0_84 = arith.constant 0 : index
    %137 = vector.load %arg12[%c1_82, %c0_83, %c0_84] : memref<2x8x32xf32, #tpu.memory_space<vmem>>, vector<1x8x32xf32>
    %138 = vector.shape_cast %137 : vector<1x8x32xf32> to vector<8x32xf32>
    %139 = arith.mulf %131, %138 : vector<8x32xf32>
    %140 = arith.truncf %139 : vector<8x32xf32> to vector<8x32xbf16>
    %cst_85 = arith.constant dense<0.000000e+00> : vector<8x4xf32>
    %141 = tpu.matmul %140, %4, %cst_85 {dimension_numbers = #tpu.dot_dimension_numbers<[1], [0], [0], [1], [0, 0, 1, 1], [], []>} : vector<8x32xbf16>, vector<32x4xbf16>, vector<8x4xf32> -> vector<8x4xf32>
    %142 = arith.maximumf %136, %141 : vector<8x4xf32>
    %143 = arith.subf %136, %142 : vector<8x4xf32>
    %144 = math.exp %143 : vector<8x4xf32>
    %145 = arith.subf %141, %142 : vector<8x4xf32>
    %146 = math.exp %145 : vector<8x4xf32>
    %147 = arith.addf %144, %146 : vector<8x4xf32>
    %148 = tpu.reciprocal %147 {approx = true} : vector<8x4xf32> -> vector<8x4xf32>
    %149 = arith.mulf %144, %148 : vector<8x4xf32>
    %150 = arith.truncf %149 : vector<8x4xf32> to vector<8x4xbf16>
    %cst_86 = arith.constant dense<0.000000e+00> : vector<8x32xf32>
    %151 = tpu.matmul %150, %5, %cst_86 {dimension_numbers = #tpu.dot_dimension_numbers<[1], [0], [0], [1], [0, 0, 1, 1], [], []>} : vector<8x4xbf16>, vector<4x32xbf16>, vector<8x32xf32> -> vector<8x32xf32>
    %c0_87 = arith.constant 0 : index
    %c0_88 = arith.constant 0 : index
    %c0_89 = arith.constant 0 : index
    %152 = vector.load %arg13[%c0_87, %c0_88, %c0_89] : memref<2x8x32xf32, #tpu.memory_space<vmem>>, vector<1x8x32xf32>
    %153 = vector.shape_cast %152 : vector<1x8x32xf32> to vector<8x32xf32>
    %154 = arith.mulf %151, %153 : vector<8x32xf32>
    %155 = arith.mulf %146, %148 : vector<8x4xf32>
    %156 = arith.truncf %155 : vector<8x4xf32> to vector<8x4xbf16>
    %cst_90 = arith.constant dense<0.000000e+00> : vector<8x32xf32>
    %157 = tpu.matmul %156, %5, %cst_90 {dimension_numbers = #tpu.dot_dimension_numbers<[1], [0], [0], [1], [0, 0, 1, 1], [], []>} : vector<8x4xbf16>, vector<4x32xbf16>, vector<8x32xf32> -> vector<8x32xf32>
    %c1_91 = arith.constant 1 : index
    %c0_92 = arith.constant 0 : index
    %c0_93 = arith.constant 0 : index
    %158 = vector.load %arg13[%c1_91, %c0_92, %c0_93] : memref<2x8x32xf32, #tpu.memory_space<vmem>>, vector<1x8x32xf32>
    %159 = vector.shape_cast %158 : vector<1x8x32xf32> to vector<8x32xf32>
    %160 = arith.mulf %157, %159 : vector<8x32xf32>
    %161 = arith.addf %154, %160 : vector<8x32xf32>
    %162 = arith.truncf %161 : vector<8x32xf32> to vector<8x32xbf16>
    %c0_94 = arith.constant 0 : index
    %c0_95 = arith.constant 0 : index
    %163 = vector.load %arg6[%c0_94, %c0_95] : memref<32x32xbf16, #tpu.memory_space<vmem>>, vector<32x32xbf16>
    %cst_96 = arith.constant dense<0.000000e+00> : vector<8x32xf32>
    %164 = tpu.matmul %162, %163, %cst_96 {dimension_numbers = #tpu.dot_dimension_numbers<[1], [0], [0], [1], [0, 0, 1, 1], [], []>} : vector<8x32xbf16>, vector<32x32xbf16>, vector<8x32xf32> -> vector<8x32xf32>
    %c0_97 = arith.constant 0 : index
    %c0_98 = arith.constant 0 : index
    %165 = vector.load %arg7[%c0_97, %c0_98] : memref<1x32xf32, #tpu.memory_space<vmem>>, vector<1x32xf32>
    %166 = vector.broadcast %165 : vector<1x32xf32> to vector<8x32xf32>
    %167 = arith.addf %164, %166 : vector<8x32xf32>
    %c1_99 = arith.constant 1 : index
    %c0_100 = arith.constant 0 : index
    %c0_101 = arith.constant 0 : index
    %168 = vector.load %arg1[%c1_99, %c0_100, %c0_101] : memref<2x8x32xf32, #tpu.memory_space<vmem>>, vector<1x8x32xf32>
    %169 = vector.shape_cast %168 : vector<1x8x32xf32> to vector<8x32xf32>
    %170 = arith.addf %169, %167 : vector<8x32xf32>
    %c1_102 = arith.constant 1 : index
    %c0_103 = arith.constant 0 : index
    %c0_104 = arith.constant 0 : index
    %171 = vector.load %arg10[%c1_102, %c0_103, %c0_104] : memref<2x8x32xf32, #tpu.memory_space<vmem>>, vector<1x8x32xf32>
    %172 = vector.shape_cast %171 : vector<1x8x32xf32> to vector<8x32xf32>
    %173 = vector.shape_cast %170 : vector<8x32xf32> to vector<1x8x32xf32>
    tpu.vector_store %arg10[%c1_102, %c0_103, %c0_104], %173 {strides = array<i32>} : memref<2x8x32xf32, #tpu.memory_space<vmem>>, vector<1x8x32xf32>,
    return
  }
  func.func @transform_0(%arg0: i32) -> (i32, i32, i32) {
    %c0_i32 = arith.constant 0 : i32
    %c0_i32_0 = arith.constant 0 : i32
    %c0_i32_1 = arith.constant 0 : i32
    return %c0_i32, %arg0, %c0_i32_0 : i32, i32, i32
  }
  func.func @transform_1(%arg0: i32) -> (i32, i32) {
    %c0_i32 = arith.constant 0 : i32
    %c0_i32_0 = arith.constant 0 : i32
    %c0_i32_1 = arith.constant 0 : i32
    return %c0_i32, %c0_i32_0 : i32, i32
  }
  func.func @transform_2(%arg0: i32) -> (i32, i32) {
    %c0_i32 = arith.constant 0 : i32
    %c0_i32_0 = arith.constant 0 : i32
    %c0_i32_1 = arith.constant 0 : i32
    return %c0_i32, %c0_i32_0 : i32, i32
  }
  func.func @transform_3(%arg0: i32) -> (i32, i32) {
    %c0_i32 = arith.constant 0 : i32
    %c0_i32_0 = arith.constant 0 : i32
    %c0_i32_1 = arith.constant 0 : i32
    return %c0_i32, %c0_i32_0 : i32, i32
  }
  func.func @transform_4(%arg0: i32) -> (i32, i32) {
    %c0_i32 = arith.constant 0 : i32
    %c0_i32_0 = arith.constant 0 : i32
    %c0_i32_1 = arith.constant 0 : i32
    return %c0_i32, %c0_i32_0 : i32, i32
  }
  func.func @transform_5(%arg0: i32) -> (i32, i32) {
    %c0_i32 = arith.constant 0 : i32
    %c0_i32_0 = arith.constant 0 : i32
    %c0_i32_1 = arith.constant 0 : i32
    return %c0_i32, %c0_i32_0 : i32, i32
  }
  func.func @transform_6(%arg0: i32) -> (i32, i32) {
    %c0_i32 = arith.constant 0 : i32
    %c0_i32_0 = arith.constant 0 : i32
    %c0_i32_1 = arith.constant 0 : i32
    return %c0_i32, %c0_i32_0 : i32, i32
  }
  func.func @transform_7(%arg0: i32) -> (i32, i32) {
    %c0_i32 = arith.constant 0 : i32
    %c0_i32_0 = arith.constant 0 : i32
    %c0_i32_1 = arith.constant 0 : i32
    return %c0_i32, %c0_i32_0 : i32, i32
  }
  func.func @transform_8(%arg0: i32) -> (i32, i32) {
    %c0_i32 = arith.constant 0 : i32
    %c0_i32_0 = arith.constant 0 : i32
    %c0_i32_1 = arith.constant 0 : i32
    return %c0_i32, %c0_i32_0 : i32, i32
  }
  func.func @transform_9(%arg0: i32) -> (i32, i32, i32) {
    %c0_i32 = arith.constant 0 : i32
    %c0_i32_0 = arith.constant 0 : i32
    %c0_i32_1 = arith.constant 0 : i32
    return %c0_i32, %arg0, %c0_i32_0 : i32, i32, i32
  }
}

module attributes {stable_mosaic.version = 11 : i64} {
  func.func @self_attn_block_kernel(%arg0: i32, %arg1: memref<2x8x32xf32, #tpu.memory_space<vmem>>, %arg2: memref<1x32xf32, #tpu.memory_space<vmem>>, %arg3: memref<1x32xf32, #tpu.memory_space<vmem>>, %arg4: memref<32x96xbf16, #tpu.memory_space<vmem>>, %arg5: memref<1x96xf32, #tpu.memory_space<vmem>>, %arg6: memref<32x32xbf16, #tpu.memory_space<vmem>>, %arg7: memref<1x32xf32, #tpu.memory_space<vmem>>, %arg8: memref<32x4xbf16, #tpu.memory_space<vmem>>, %arg9: memref<4x32xbf16, #tpu.memory_space<vmem>>, %arg10: memref<2x8x32xf32, #tpu.memory_space<vmem>>, %arg11: memref<2x8x32xf32, #tpu.memory_space<vmem>>, %arg12: memref<2x8x32xf32, #tpu.memory_space<vmem>>, %arg13: memref<2x8x32xf32, #tpu.memory_space<vmem>>) attributes {dimension_semantics = [#tpu.dimension_semantics<parallel>], iteration_bounds = array<i64: 1>, scalar_prefetch = 0 : i64, scratch_operands = 3 : i64, tpu.core_type = #tpu.core_type<tc>, window_params = [{transform_indices = @transform_0, window_bounds = array<i64: 2, 8, 32>}, {pipeline_mode = #tpu.pipeline_mode<synchronous>, transform_indices = @transform_1, window_bounds = array<i64: 1, 32>}, {pipeline_mode = #tpu.pipeline_mode<synchronous>, transform_indices = @transform_2, window_bounds = array<i64: 1, 32>}, {pipeline_mode = #tpu.pipeline_mode<synchronous>, transform_indices = @transform_3, window_bounds = array<i64: 32, 96>}, {pipeline_mode = #tpu.pipeline_mode<synchronous>, transform_indices = @transform_4, window_bounds = array<i64: 1, 96>}, {pipeline_mode = #tpu.pipeline_mode<synchronous>, transform_indices = @transform_5, window_bounds = array<i64: 32, 32>}, {pipeline_mode = #tpu.pipeline_mode<synchronous>, transform_indices = @transform_6, window_bounds = array<i64: 1, 32>}, {pipeline_mode = #tpu.pipeline_mode<synchronous>, transform_indices = @transform_7, window_bounds = array<i64: 32, 4>}, {pipeline_mode = #tpu.pipeline_mode<synchronous>, transform_indices = @transform_8, window_bounds = array<i64: 4, 32>}, {transform_indices = @transform_9, window_bounds = array<i64: 2, 8, 32>}]} {
    %c0 = arith.constant 0 : index
    %c0_0 = arith.constant 0 : index
    %0 = vector.load %arg2[%c0, %c0_0] : memref<1x32xf32, #tpu.memory_space<vmem>>, vector<1x32xf32>
    %c0_1 = arith.constant 0 : index
    %c0_2 = arith.constant 0 : index
    %1 = vector.load %arg3[%c0_1, %c0_2] : memref<1x32xf32, #tpu.memory_space<vmem>>, vector<1x32xf32>
    %c0_3 = arith.constant 0 : index
    %c0_4 = arith.constant 0 : index
    %2 = vector.load %arg4[%c0_3, %c0_4] : memref<32x96xbf16, #tpu.memory_space<vmem>>, vector<32x96xbf16>
    %c0_5 = arith.constant 0 : index
    %c0_6 = arith.constant 0 : index
    %3 = vector.load %arg5[%c0_5, %c0_6] : memref<1x96xf32, #tpu.memory_space<vmem>>, vector<1x96xf32>
    %c0_7 = arith.constant 0 : index
    %c0_8 = arith.constant 0 : index
    %4 = vector.load %arg8[%c0_7, %c0_8] : memref<32x4xbf16, #tpu.memory_space<vmem>>, vector<32x4xbf16>
    %c0_9 = arith.constant 0 : index
    %c0_10 = arith.constant 0 : index
    %5 = vector.load %arg9[%c0_9, %c0_10] : memref<4x32xbf16, #tpu.memory_space<vmem>>, vector<4x32xbf16>
    %c0_11 = arith.constant 0 : index
    %c0_12 = arith.constant 0 : index
    %c0_13 = arith.constant 0 : index
    %6 = vector.load %arg1[%c0_11, %c0_12, %c0_13] : memref<2x8x32xf32, #tpu.memory_space<vmem>>, vector<1x8x32xf32>
    %7 = vector.shape_cast %6 : vector<1x8x32xf32> to vector<8x32xf32>
    %cst = arith.constant dense<0.000000e+00> : vector<8xf32>
    %8 = vector.multi_reduction <add>, %7, %cst [1] : vector<8x32xf32> to vector<8xf32>
    %9 = vector.shape_cast %8 : vector<8xf32> to vector<8x1xf32>
    %cst_14 = arith.constant 3.200000e+01 : f32
    %10 = vector.broadcast %cst_14 : f32 to vector<8x1xf32>
    %11 = arith.divf %9, %10 : vector<8x1xf32>
    %12 = vector.broadcast %11 : vector<8x1xf32> to vector<8x32xf32>
    %13 = arith.subf %7, %12 : vector<8x32xf32>
    %14 = arith.mulf %13, %13 : vector<8x32xf32>
    %cst_15 = arith.constant dense<0.000000e+00> : vector<8xf32>
    %15 = vector.multi_reduction <add>, %14, %cst_15 [1] : vector<8x32xf32> to vector<8xf32>
    %16 = vector.shape_cast %15 : vector<8xf32> to vector<8x1xf32>
    %cst_16 = arith.constant 3.200000e+01 : f32
    %17 = vector.broadcast %cst_16 : f32 to vector<8x1xf32>
    %18 = arith.divf %16, %17 : vector<8x1xf32>
    %19 = vector.broadcast %11 : vector<8x1xf32> to vector<8x32xf32>
    %20 = arith.subf %7, %19 : vector<8x32xf32>
    %cst_17 = arith.constant 9.99999974E-6 : f32
    %21 = vector.broadcast %cst_17 : f32 to vector<8x1xf32>
    %22 = arith.addf %18, %21 : vector<8x1xf32>
    %23 = math.rsqrt %22 : vector<8x1xf32>
    %24 = vector.broadcast %23 : vector<8x1xf32> to vector<8x32xf32>
    %25 = arith.mulf %20, %24 : vector<8x32xf32>
    %26 = vector.broadcast %0 : vector<1x32xf32> to vector<8x32xf32>
    %27 = arith.mulf %25, %26 : vector<8x32xf32>
    %28 = vector.broadcast %1 : vector<1x32xf32> to vector<8x32xf32>
    %29 = arith.addf %27, %28 : vector<8x32xf32>
    %30 = arith.truncf %29 : vector<8x32xf32> to vector<8x32xbf16>
    %cst_18 = arith.constant dense<0.000000e+00> : vector<8x96xf32>
    %31 = tpu.matmul %30, %2, %cst_18 {dimension_numbers = #tpu.dot_dimension_numbers<[1], [0], [0], [1], [0, 0, 1, 1], [], []>} : vector<8x32xbf16>, vector<32x96xbf16>, vector<8x96xf32> -> vector<8x96xf32>
    %32 = vector.broadcast %3 : vector<1x96xf32> to vector<8x96xf32>
    %33 = arith.addf %31, %32 : vector<8x96xf32>
    %34 = vector.extract_strided_slice %33 {offsets = [0, 0], sizes = [8, 32], strides = [1, 1]} : vector<8x96xf32> to vector<8x32xf32>
    %c0_19 = arith.constant 0 : index
    %c0_20 = arith.constant 0 : index
    %c0_21 = arith.constant 0 : index
    %35 = vector.load %arg11[%c0_19, %c0_20, %c0_21] : memref<2x8x32xf32, #tpu.memory_space<vmem>>, vector<1x8x32xf32>
    %36 = vector.shape_cast %35 : vector<1x8x32xf32> to vector<8x32xf32>
    %37 = vector.shape_cast %34 : vector<8x32xf32> to vector<1x8x32xf32>
    tpu.vector_store %arg11[%c0_19, %c0_20, %c0_21], %37 {strides = array<i32>} : memref<2x8x32xf32, #tpu.memory_space<vmem>>, vector<1x8x32xf32>,
    %38 = vector.extract_strided_slice %33 {offsets = [0, 32], sizes = [8, 32], strides = [1, 1]} : vector<8x96xf32> to vector<8x32xf32>
    %c0_22 = arith.constant 0 : index
    %c0_23 = arith.constant 0 : index
    %c0_24 = arith.constant 0 : index
    %39 = vector.load %arg12[%c0_22, %c0_23, %c0_24] : memref<2x8x32xf32, #tpu.memory_space<vmem>>, vector<1x8x32xf32>
    %40 = vector.shape_cast %39 : vector<1x8x32xf32> to vector<8x32xf32>
    %41 = vector.shape_cast %38 : vector<8x32xf32> to vector<1x8x32xf32>
    tpu.vector_store %arg12[%c0_22, %c0_23, %c0_24], %41 {strides = array<i32>} : memref<2x8x32xf32, #tpu.memory_space<vmem>>, vector<1x8x32xf32>,
    %42 = vector.extract_strided_slice %33 {offsets = [0, 64], sizes = [8, 32], strides = [1, 1]} : vector<8x96xf32> to vector<8x32xf32>
    %c0_25 = arith.constant 0 : index
    %c0_26 = arith.constant 0 : index
    %c0_27 = arith.constant 0 : index
    %43 = vector.load %arg13[%c0_25, %c0_26, %c0_27] : memref<2x8x32xf32, #tpu.memory_space<vmem>>, vector<1x8x32xf32>
    %44 = vector.shape_cast %43 : vector<1x8x32xf32> to vector<8x32xf32>
    %45 = vector.shape_cast %42 : vector<8x32xf32> to vector<1x8x32xf32>
    tpu.vector_store %arg13[%c0_25, %c0_26, %c0_27], %45 {strides = array<i32>} : memref<2x8x32xf32, #tpu.memory_space<vmem>>, vector<1x8x32xf32>,
    %c1 = arith.constant 1 : index
    %c0_28 = arith.constant 0 : index
    %c0_29 = arith.constant 0 : index
    %46 = vector.load %arg1[%c1, %c0_28, %c0_29] : memref<2x8x32xf32, #tpu.memory_space<vmem>>, vector<1x8x32xf32>
    %47 = vector.shape_cast %46 : vector<1x8x32xf32> to vector<8x32xf32>
    %cst_30 = arith.constant dense<0.000000e+00> : vector<8xf32>
    %48 = vector.multi_reduction <add>, %47, %cst_30 [1] : vector<8x32xf32> to vector<8xf32>
    %49 = vector.shape_cast %48 : vector<8xf32> to vector<8x1xf32>
    %cst_31 = arith.constant 3.200000e+01 : f32
    %50 = vector.broadcast %cst_31 : f32 to vector<8x1xf32>
    %51 = arith.divf %49, %50 : vector<8x1xf32>
    %52 = vector.broadcast %51 : vector<8x1xf32> to vector<8x32xf32>
    %53 = arith.subf %47, %52 : vector<8x32xf32>
    %54 = arith.mulf %53, %53 : vector<8x32xf32>
    %cst_32 = arith.constant dense<0.000000e+00> : vector<8xf32>
    %55 = vector.multi_reduction <add>, %54, %cst_32 [1] : vector<8x32xf32> to vector<8xf32>
    %56 = vector.shape_cast %55 : vector<8xf32> to vector<8x1xf32>
    %cst_33 = arith.constant 3.200000e+01 : f32
    %57 = vector.broadcast %cst_33 : f32 to vector<8x1xf32>
    %58 = arith.divf %56, %57 : vector<8x1xf32>
    %59 = vector.broadcast %51 : vector<8x1xf32> to vector<8x32xf32>
    %60 = arith.subf %47, %59 : vector<8x32xf32>
    %cst_34 = arith.constant 9.99999974E-6 : f32
    %61 = vector.broadcast %cst_34 : f32 to vector<8x1xf32>
    %62 = arith.addf %58, %61 : vector<8x1xf32>
    %63 = math.rsqrt %62 : vector<8x1xf32>
    %64 = vector.broadcast %63 : vector<8x1xf32> to vector<8x32xf32>
    %65 = arith.mulf %60, %64 : vector<8x32xf32>
    %66 = vector.broadcast %0 : vector<1x32xf32> to vector<8x32xf32>
    %67 = arith.mulf %65, %66 : vector<8x32xf32>
    %68 = vector.broadcast %1 : vector<1x32xf32> to vector<8x32xf32>
    %69 = arith.addf %67, %68 : vector<8x32xf32>
    %70 = arith.truncf %69 : vector<8x32xf32> to vector<8x32xbf16>
    %cst_35 = arith.constant dense<0.000000e+00> : vector<8x96xf32>
    %71 = tpu.matmul %70, %2, %cst_35 {dimension_numbers = #tpu.dot_dimension_numbers<[1], [0], [0], [1], [0, 0, 1, 1], [], []>} : vector<8x32xbf16>, vector<32x96xbf16>, vector<8x96xf32> -> vector<8x96xf32>
    %72 = vector.broadcast %3 : vector<1x96xf32> to vector<8x96xf32>
    %73 = arith.addf %71, %72 : vector<8x96xf32>
    %74 = vector.extract_strided_slice %73 {offsets = [0, 0], sizes = [8, 32], strides = [1, 1]} : vector<8x96xf32> to vector<8x32xf32>
    %c1_36 = arith.constant 1 : index
    %c0_37 = arith.constant 0 : index
    %c0_38 = arith.constant 0 : index
    %75 = vector.load %arg11[%c1_36, %c0_37, %c0_38] : memref<2x8x32xf32, #tpu.memory_space<vmem>>, vector<1x8x32xf32>
    %76 = vector.shape_cast %75 : vector<1x8x32xf32> to vector<8x32xf32>
    %77 = vector.shape_cast %74 : vector<8x32xf32> to vector<1x8x32xf32>
    tpu.vector_store %arg11[%c1_36, %c0_37, %c0_38], %77 {strides = array<i32>} : memref<2x8x32xf32, #tpu.memory_space<vmem>>, vector<1x8x32xf32>,
    %78 = vector.extract_strided_slice %73 {offsets = [0, 32], sizes = [8, 32], strides = [1, 1]} : vector<8x96xf32> to vector<8x32xf32>
    %c1_39 = arith.constant 1 : index
    %c0_40 = arith.constant 0 : index
    %c0_41 = arith.constant 0 : index
    %79 = vector.load %arg12[%c1_39, %c0_40, %c0_41] : memref<2x8x32xf32, #tpu.memory_space<vmem>>, vector<1x8x32xf32>
    %80 = vector.shape_cast %79 : vector<1x8x32xf32> to vector<8x32xf32>
    %81 = vector.shape_cast %78 : vector<8x32xf32> to vector<1x8x32xf32>
    tpu.vector_store %arg12[%c1_39, %c0_40, %c0_41], %81 {strides = array<i32>} : memref<2x8x32xf32, #tpu.memory_space<vmem>>, vector<1x8x32xf32>,
    %82 = vector.extract_strided_slice %73 {offsets = [0, 64], sizes = [8, 32], strides = [1, 1]} : vector<8x96xf32> to vector<8x32xf32>
    %c1_42 = arith.constant 1 : index
    %c0_43 = arith.constant 0 : index
    %c0_44 = arith.constant 0 : index
    %83 = vector.load %arg13[%c1_42, %c0_43, %c0_44] : memref<2x8x32xf32, #tpu.memory_space<vmem>>, vector<1x8x32xf32>
    %84 = vector.shape_cast %83 : vector<1x8x32xf32> to vector<8x32xf32>
    %85 = vector.shape_cast %82 : vector<8x32xf32> to vector<1x8x32xf32>
    tpu.vector_store %arg13[%c1_42, %c0_43, %c0_44], %85 {strides = array<i32>} : memref<2x8x32xf32, #tpu.memory_space<vmem>>, vector<1x8x32xf32>,
    %c0_45 = arith.constant 0 : index
    %c0_46 = arith.constant 0 : index
    %c0_47 = arith.constant 0 : index
    %86 = vector.load %arg11[%c0_45, %c0_46, %c0_47] : memref<2x8x32xf32, #tpu.memory_space<vmem>>, vector<1x8x32xf32>
    %87 = vector.shape_cast %86 : vector<1x8x32xf32> to vector<8x32xf32>
    %c0_48 = arith.constant 0 : index
    %c0_49 = arith.constant 0 : index
    %c0_50 = arith.constant 0 : index
    %88 = vector.load %arg12[%c0_48, %c0_49, %c0_50] : memref<2x8x32xf32, #tpu.memory_space<vmem>>, vector<1x8x32xf32>
    %89 = vector.shape_cast %88 : vector<1x8x32xf32> to vector<8x32xf32>
    %90 = arith.mulf %87, %89 : vector<8x32xf32>
    %91 = arith.truncf %90 : vector<8x32xf32> to vector<8x32xbf16>
    %cst_51 = arith.constant dense<0.000000e+00> : vector<8x4xf32>
    %92 = tpu.matmul %91, %4, %cst_51 {dimension_numbers = #tpu.dot_dimension_numbers<[1], [0], [0], [1], [0, 0, 1, 1], [], []>} : vector<8x32xbf16>, vector<32x4xbf16>, vector<8x4xf32> -> vector<8x4xf32>
    %c1_52 = arith.constant 1 : index
    %c0_53 = arith.constant 0 : index
    %c0_54 = arith.constant 0 : index
    %93 = vector.load %arg12[%c1_52, %c0_53, %c0_54] : memref<2x8x32xf32, #tpu.memory_space<vmem>>, vector<1x8x32xf32>
    %94 = vector.shape_cast %93 : vector<1x8x32xf32> to vector<8x32xf32>
    %95 = arith.mulf %87, %94 : vector<8x32xf32>
    %96 = arith.truncf %95 : vector<8x32xf32> to vector<8x32xbf16>
    %cst_55 = arith.constant dense<0.000000e+00> : vector<8x4xf32>
    %97 = tpu.matmul %96, %4, %cst_55 {dimension_numbers = #tpu.dot_dimension_numbers<[1], [0], [0], [1], [0, 0, 1, 1], [], []>} : vector<8x32xbf16>, vector<32x4xbf16>, vector<8x4xf32> -> vector<8x4xf32>
    %98 = arith.maximumf %92, %97 : vector<8x4xf32>
    %99 = arith.subf %92, %98 : vector<8x4xf32>
    %100 = math.exp %99 : vector<8x4xf32>
    %101 = arith.subf %97, %98 : vector<8x4xf32>
    %102 = math.exp %101 : vector<8x4xf32>
    %103 = arith.addf %100, %102 : vector<8x4xf32>
    %104 = tpu.reciprocal %103 {approx = true} : vector<8x4xf32> -> vector<8x4xf32>
    %105 = arith.mulf %100, %104 : vector<8x4xf32>
    %106 = arith.truncf %105 : vector<8x4xf32> to vector<8x4xbf16>
    %cst_56 = arith.constant dense<0.000000e+00> : vector<8x32xf32>
    %107 = tpu.matmul %106, %5, %cst_56 {dimension_numbers = #tpu.dot_dimension_numbers<[1], [0], [0], [1], [0, 0, 1, 1], [], []>} : vector<8x4xbf16>, vector<4x32xbf16>, vector<8x32xf32> -> vector<8x32xf32>
    %c0_57 = arith.constant 0 : index
    %c0_58 = arith.constant 0 : index
    %c0_59 = arith.constant 0 : index
    %108 = vector.load %arg13[%c0_57, %c0_58, %c0_59] : memref<2x8x32xf32, #tpu.memory_space<vmem>>, vector<1x8x32xf32>
    %109 = vector.shape_cast %108 : vector<1x8x32xf32> to vector<8x32xf32>
    %110 = arith.mulf %107, %109 : vector<8x32xf32>
    %111 = arith.mulf %102, %104 : vector<8x4xf32>
    %112 = arith.truncf %111 : vector<8x4xf32> to vector<8x4xbf16>
    %cst_60 = arith.constant dense<0.000000e+00> : vector<8x32xf32>
    %113 = tpu.matmul %112, %5, %cst_60 {dimension_numbers = #tpu.dot_dimension_numbers<[1], [0], [0], [1], [0, 0, 1, 1], [], []>} : vector<8x4xbf16>, vector<4x32xbf16>, vector<8x32xf32> -> vector<8x32xf32>
    %c1_61 = arith.constant 1 : index
    %c0_62 = arith.constant 0 : index
    %c0_63 = arith.constant 0 : index
    %114 = vector.load %arg13[%c1_61, %c0_62, %c0_63] : memref<2x8x32xf32, #tpu.memory_space<vmem>>, vector<1x8x32xf32>
    %115 = vector.shape_cast %114 : vector<1x8x32xf32> to vector<8x32xf32>
    %116 = arith.mulf %113, %115 : vector<8x32xf32>
    %117 = arith.addf %110, %116 : vector<8x32xf32>
    %118 = arith.truncf %117 : vector<8x32xf32> to vector<8x32xbf16>
    %c0_64 = arith.constant 0 : index
    %c0_65 = arith.constant 0 : index
    %119 = vector.load %arg6[%c0_64, %c0_65] : memref<32x32xbf16, #tpu.memory_space<vmem>>, vector<32x32xbf16>
    %cst_66 = arith.constant dense<0.000000e+00> : vector<8x32xf32>
    %120 = tpu.matmul %118, %119, %cst_66 {dimension_numbers = #tpu.dot_dimension_numbers<[1], [0], [0], [1], [0, 0, 1, 1], [], []>} : vector<8x32xbf16>, vector<32x32xbf16>, vector<8x32xf32> -> vector<8x32xf32>
    %c0_67 = arith.constant 0 : index
    %c0_68 = arith.constant 0 : index
    %121 = vector.load %arg7[%c0_67, %c0_68] : memref<1x32xf32, #tpu.memory_space<vmem>>, vector<1x32xf32>
    %122 = vector.broadcast %121 : vector<1x32xf32> to vector<8x32xf32>
    %123 = arith.addf %120, %122 : vector<8x32xf32>
    %c0_69 = arith.constant 0 : index
    %c0_70 = arith.constant 0 : index
    %c0_71 = arith.constant 0 : index
    %124 = vector.load %arg1[%c0_69, %c0_70, %c0_71] : memref<2x8x32xf32, #tpu.memory_space<vmem>>, vector<1x8x32xf32>
    %125 = vector.shape_cast %124 : vector<1x8x32xf32> to vector<8x32xf32>
    %126 = arith.addf %125, %123 : vector<8x32xf32>
    %c0_72 = arith.constant 0 : index
    %c0_73 = arith.constant 0 : index
    %c0_74 = arith.constant 0 : index
    %127 = vector.load %arg10[%c0_72, %c0_73, %c0_74] : memref<2x8x32xf32, #tpu.memory_space<vmem>>, vector<1x8x32xf32>
    %128 = vector.shape_cast %127 : vector<1x8x32xf32> to vector<8x32xf32>
    %129 = vector.shape_cast %126 : vector<8x32xf32> to vector<1x8x32xf32>
    tpu.vector_store %arg10[%c0_72, %c0_73, %c0_74], %129 {strides = array<i32>} : memref<2x8x32xf32, #tpu.memory_space<vmem>>, vector<1x8x32xf32>,
    %c1_75 = arith.constant 1 : index
    %c0_76 = arith.constant 0 : index
    %c0_77 = arith.constant 0 : index
    %130 = vector.load %arg11[%c1_75, %c0_76, %c0_77] : memref<2x8x32xf32, #tpu.memory_space<vmem>>, vector<1x8x32xf32>
    %131 = vector.shape_cast %130 : vector<1x8x32xf32> to vector<8x32xf32>
    %c0_78 = arith.constant 0 : index
    %c0_79 = arith.constant 0 : index
    %c0_80 = arith.constant 0 : index
    %132 = vector.load %arg12[%c0_78, %c0_79, %c0_80] : memref<2x8x32xf32, #tpu.memory_space<vmem>>, vector<1x8x32xf32>
    %133 = vector.shape_cast %132 : vector<1x8x32xf32> to vector<8x32xf32>
    %134 = arith.mulf %131, %133 : vector<8x32xf32>
    %135 = arith.truncf %134 : vector<8x32xf32> to vector<8x32xbf16>
    %cst_81 = arith.constant dense<0.000000e+00> : vector<8x4xf32>
    %136 = tpu.matmul %135, %4, %cst_81 {dimension_numbers = #tpu.dot_dimension_numbers<[1], [0], [0], [1], [0, 0, 1, 1], [], []>} : vector<8x32xbf16>, vector<32x4xbf16>, vector<8x4xf32> -> vector<8x4xf32>
    %c1_82 = arith.constant 1 : index
    %c0_83 = arith.constant 0 : index
    %c0_84 = arith.constant 0 : index
    %137 = vector.load %arg12[%c1_82, %c0_83, %c0_84] : memref<2x8x32xf32, #tpu.memory_space<vmem>>, vector<1x8x32xf32>
    %138 = vector.shape_cast %137 : vector<1x8x32xf32> to vector<8x32xf32>
    %139 = arith.mulf %131, %138 : vector<8x32xf32>
    %140 = arith.truncf %139 : vector<8x32xf32> to vector<8x32xbf16>
    %cst_85 = arith.constant dense<0.000000e+00> : vector<8x4xf32>
    %141 = tpu.matmul %140, %4, %cst_85 {dimension_numbers = #tpu.dot_dimension_numbers<[1], [0], [0], [1], [0, 0, 1, 1], [], []>} : vector<8x32xbf16>, vector<32x4xbf16>, vector<8x4xf32> -> vector<8x4xf32>
    %142 = arith.maximumf %136, %141 : vector<8x4xf32>
    %143 = arith.subf %136, %142 : vector<8x4xf32>
    %144 = math.exp %143 : vector<8x4xf32>
    %145 = arith.subf %141, %142 : vector<8x4xf32>
    %146 = math.exp %145 : vector<8x4xf32>
    %147 = arith.addf %144, %146 : vector<8x4xf32>
    %148 = tpu.reciprocal %147 {approx = true} : vector<8x4xf32> -> vector<8x4xf32>
    %149 = arith.mulf %144, %148 : vector<8x4xf32>
    %150 = arith.truncf %149 : vector<8x4xf32> to vector<8x4xbf16>
    %cst_86 = arith.constant dense<0.000000e+00> : vector<8x32xf32>
    %151 = tpu.matmul %150, %5, %cst_86 {dimension_numbers = #tpu.dot_dimension_numbers<[1], [0], [0], [1], [0, 0, 1, 1], [], []>} : vector<8x4xbf16>, vector<4x32xbf16>, vector<8x32xf32> -> vector<8x32xf32>
    %c0_87 = arith.constant 0 : index
    %c0_88 = arith.constant 0 : index
    %c0_89 = arith.constant 0 : index
    %152 = vector.load %arg13[%c0_87, %c0_88, %c0_89] : memref<2x8x32xf32, #tpu.memory_space<vmem>>, vector<1x8x32xf32>
    %153 = vector.shape_cast %152 : vector<1x8x32xf32> to vector<8x32xf32>
    %154 = arith.mulf %151, %153 : vector<8x32xf32>
    %155 = arith.mulf %146, %148 : vector<8x4xf32>
    %156 = arith.truncf %155 : vector<8x4xf32> to vector<8x4xbf16>
    %cst_90 = arith.constant dense<0.000000e+00> : vector<8x32xf32>
    %157 = tpu.matmul %156, %5, %cst_90 {dimension_numbers = #tpu.dot_dimension_numbers<[1], [0], [0], [1], [0, 0, 1, 1], [], []>} : vector<8x4xbf16>, vector<4x32xbf16>, vector<8x32xf32> -> vector<8x32xf32>
    %c1_91 = arith.constant 1 : index
    %c0_92 = arith.constant 0 : index
    %c0_93 = arith.constant 0 : index
    %158 = vector.load %arg13[%c1_91, %c0_92, %c0_93] : memref<2x8x32xf32, #tpu.memory_space<vmem>>, vector<1x8x32xf32>
    %159 = vector.shape_cast %158 : vector<1x8x32xf32> to vector<8x32xf32>
    %160 = arith.mulf %157, %159 : vector<8x32xf32>
    %161 = arith.addf %154, %160 : vector<8x32xf32>
    %162 = arith.truncf %161 : vector<8x32xf32> to vector<8x32xbf16>
    %c0_94 = arith.constant 0 : index
    %c0_95 = arith.constant 0 : index
    %163 = vector.load %arg6[%c0_94, %c0_95] : memref<32x32xbf16, #tpu.memory_space<vmem>>, vector<32x32xbf16>
    %cst_96 = arith.constant dense<0.000000e+00> : vector<8x32xf32>
    %164 = tpu.matmul %162, %163, %cst_96 {dimension_numbers = #tpu.dot_dimension_numbers<[1], [0], [0], [1], [0, 0, 1, 1], [], []>} : vector<8x32xbf16>, vector<32x32xbf16>, vector<8x32xf32> -> vector<8x32xf32>
    %c0_97 = arith.constant 0 : index
    %c0_98 = arith.constant 0 : index
    %165 = vector.load %arg7[%c0_97, %c0_98] : memref<1x32xf32, #tpu.memory_space<vmem>>, vector<1x32xf32>
    %166 = vector.broadcast %165 : vector<1x32xf32> to vector<8x32xf32>
    %167 = arith.addf %164, %166 : vector<8x32xf32>
    %c1_99 = arith.constant 1 : index
    %c0_100 = arith.constant 0 : index
    %c0_101 = arith.constant 0 : index
    %168 = vector.load %arg1[%c1_99, %c0_100, %c0_101] : memref<2x8x32xf32, #tpu.memory_space<vmem>>, vector<1x8x32xf32>
    %169 = vector.shape_cast %168 : vector<1x8x32xf32> to vector<8x32xf32>
    %170 = arith.addf %169, %167 : vector<8x32xf32>
    %c1_102 = arith.constant 1 : index
    %c0_103 = arith.constant 0 : index
    %c0_104 = arith.constant 0 : index
    %171 = vector.load %arg10[%c1_102, %c0_103, %c0_104] : memref<2x8x32xf32, #tpu.memory_space<vmem>>, vector<1x8x32xf32>
    %172 = vector.shape_cast %171 : vector<1x8x32xf32> to vector<8x32xf32>
    %173 = vector.shape_cast %170 : vector<8x32xf32> to vector<1x8x32xf32>
    tpu.vector_store %arg10[%c1_102, %c0_103, %c0_104], %173 {strides = array<i32>} : memref<2x8x32xf32, #tpu.memory_space<vmem>>, vector<1x8x32xf32>,
    return
  }
  func.func @transform_0(%arg0: i32) -> (i32, i32, i32) {
    %c0_i32 = arith.constant 0 : i32
    %c0_i32_0 = arith.constant 0 : i32
    %c0_i32_1 = arith.constant 0 : i32
    return %c0_i32, %arg0, %c0_i32_0 : i32, i32, i32
  }
  func.func @transform_1(%arg0: i32) -> (i32, i32) {
    %c0_i32 = arith.constant 0 : i32
    %c0_i32_0 = arith.constant 0 : i32
    %c0_i32_1 = arith.constant 0 : i32
    return %c0_i32, %c0_i32_0 : i32, i32
  }
  func.func @transform_2(%arg0: i32) -> (i32, i32) {
    %c0_i32 = arith.constant 0 : i32
    %c0_i32_0 = arith.constant 0 : i32
    %c0_i32_1 = arith.constant 0 : i32
    return %c0_i32, %c0_i32_0 : i32, i32
  }
  func.func @transform_3(%arg0: i32) -> (i32, i32) {
    %c0_i32 = arith.constant 0 : i32
    %c0_i32_0 = arith.constant 0 : i32
    %c0_i32_1 = arith.constant 0 : i32
    return %c0_i32, %c0_i32_0 : i32, i32
  }
  func.func @transform_4(%arg0: i32) -> (i32, i32) {
    %c0_i32 = arith.constant 0 : i32
    %c0_i32_0 = arith.constant 0 : i32
    %c0_i32_1 = arith.constant 0 : i32
    return %c0_i32, %c0_i32_0 : i32, i32
  }
  func.func @transform_5(%arg0: i32) -> (i32, i32) {
    %c0_i32 = arith.constant 0 : i32
    %c0_i32_0 = arith.constant 0 : i32
    %c0_i32_1 = arith.constant 0 : i32
    return %c0_i32, %c0_i32_0 : i32, i32
  }
  func.func @transform_6(%arg0: i32) -> (i32, i32) {
    %c0_i32 = arith.constant 0 : i32
    %c0_i32_0 = arith.constant 0 : i32
    %c0_i32_1 = arith.constant 0 : i32
    return %c0_i32, %c0_i32_0 : i32, i32
  }
  func.func @transform_7(%arg0: i32) -> (i32, i32) {
    %c0_i32 = arith.constant 0 : i32
    %c0_i32_0 = arith.constant 0 : i32
    %c0_i32_1 = arith.constant 0 : i32
    return %c0_i32, %c0_i32_0 : i32, i32
  }
  func.func @transform_8(%arg0: i32) -> (i32, i32) {
    %c0_i32 = arith.constant 0 : i32
    %c0_i32_0 = arith.constant 0 : i32
    %c0_i32_1 = arith.constant 0 : i32
    return %c0_i32, %c0_i32_0 : i32, i32
  }
  func.func @transform_9(%arg0: i32) -> (i32, i32, i32) {
    %c0_i32 = arith.constant 0 : i32
    %c0_i32_0 = arith.constant 0 : i32
    %c0_i32_1 = arith.constant 0 : i32
    return %c0_i32, %arg0, %c0_i32_0 : i32, i32, i32
  }
}

</mosaic_0001>

<bundles_post_ra>
// kernel: tpu_custom_call.1
= control target key start
LH: loop header
LB: loop body
LE: loop exit
PB: predicated region body
PF: predicated region fallthrough
CT: control target
= control target key end

     0   :  { %14 = vsyncpa [#allocation6], 0  ;;  %s1407_s0 = inlined_call_operand.vmem [shape: f32[2,8,32], index: 0, kind: input, shape index: {}]   ;;  %s1408_s1 = inlined_call_operand.hbm [shape: f32[1,32], index: 1, kind: input, shape index: {}]   ;;  %s1409_s2 = inlined_call_operand.hbm [shape: f32[1,32], index: 2, kind: input, shape index: {}]   ;;  %s1410_s3 = inlined_call_operand.hbm [shape: bf16[32,96], index: 3, kind: input, shape index: {}]   ;;  %s1411_s4 = inlined_call_operand.hbm [shape: f32[1,96], index: 4, kind: input, shape index: {}]   ;;  %s1412_s5 = inlined_call_operand.vmem [shape: bf16[32,32], index: 5, kind: input, shape index: {}]   ;;  %s1413_s6 = inlined_call_operand.vmem [shape: f32[1,32], index: 6, kind: input, shape index: {}]   ;;  %s1414_s7 = inlined_call_operand.vmem [shape: bf16[32,4], index: 7, kind: input, shape index: {}]   ;;  %s1415_s8 = inlined_call_operand.vmem [shape: bf16[4,32], index: 8, kind: input, shape index: {}]   ;;  %s1416_s9 = inlined_call_operand.hbm [shape: f32[2,8,32], index: 9, kind: output, shape index: {}]  }
   0x1   :  { %15 = vsyncpa [#allocation9], 0 }
   0x2   :  { %16 = vsyncpa [#allocation12], 0 }
   0x3   :  { %17 = vsyncpa [#allocation7], 0  ;;  %s1143_s30 = smov [#allocation8]   ;;  %s1144_s11 = smov [#allocation5]  }
   0x4   :  { %s36_s10 = sshll.u32 %s1143_s30, 4  ;;  %s26_s12 = sshll.u32 %s1144_s11, 4  ;;  %s37_s10 = int_to_ptr.vmem [resolvable:$true] %s36_s10  ;;  %s27_s12 = int_to_ptr.vmem [resolvable:$true] %s26_s12 }
   0x5   :  { %s1025_s15 = scalar_lea.hbm %s1409_s2, 16 }
   0x6   :  { %p1026_p0 = scmp.ne.s32.totalorder %s1409_s2, %s1025_s15  ;;  %p1029_p1 = scmp.lt.u32.totalorder %s1025_s15, %s1409_s2 }
   0x8   :  { %p1031_p2 = pnand %p1029_p1, %p1026_p0 }
   0xa   :  { %1034 = shalt.err (!%p1031_p2)
}
   0xb   :  { %s1035_s20 = scalar_lea.vmem %s37_s10, 16  ;;  %s1039_s21 = scalar_lea.vmem %s37_s10, 32 }
   0xc   :  { %p1036_p3 = scmp.ne.s32.totalorder %s37_s10, %s1035_s20  ;;  %p1040_p4 = scmp.lt.s32.totalorder %s37_s10, %s37_s10 }
   0xd   :  { %p1041_p5 = scmp.lt.s32.totalorder %s1039_s21, %s1035_s20 }
   0xf   :  { %p1042_p6 = por %p1041_p5, %p1040_p4 }
  0x11   :  { %p1043_p7 = pnand %p1042_p6, %p1036_p3 }
  0x13   :  { %1046 = shalt.err (!%p1043_p7)
}
  0x14   :  { %39 = dma.hbm_to_vmem [thread:$0]  %s1409_s2, 16, %s37_s10, [#allocation9]  }
  0x15   :  { %s1047_s26 = scalar_lea.hbm %s1408_s1, 16 }
  0x16   :  { %p1048_p8 = scmp.ne.s32.totalorder %s1408_s1, %s1047_s26  ;;  %p1051_p9 = scmp.lt.u32.totalorder %s1047_s26, %s1408_s1 }
  0x18   :  { %p1053_p10 = pnand %p1051_p9, %p1048_p8 }
  0x1a   :  { %1056 = shalt.err (!%p1053_p10)
}
  0x1b   :  { %s1057_s11 = scalar_lea.vmem %s27_s12, 16  ;;  %s1061_s13 = scalar_lea.vmem %s27_s12, 32 }
  0x1c   :  { %p1058_p11 = scmp.ne.s32.totalorder %s27_s12, %s1057_s11  ;;  %p1062_p12 = scmp.lt.s32.totalorder %s27_s12, %s27_s12 }
  0x1d   :  { %p1063_p13 = scmp.lt.s32.totalorder %s1061_s13, %s1057_s11 }
  0x1f   :  { %p1064_p0 = por %p1063_p13, %p1062_p12 }
  0x21   :  { %p1065_p1 = pnand %p1064_p0, %p1058_p11 }
  0x23   :  { %1068 = shalt.err (!%p1065_p1)
}
  0x24   :  { %29 = dma.hbm_to_vmem [thread:$0]  %s1408_s1, 16, %s27_s12, [#allocation6]  }
  0x25   :  { %s1145_s14 = smov [#allocation10]   ;;  %s1069_s18 = scalar_lea.hbm %s1410_s3, 256 }
  0x26   :  { %s45_s15 = sshll.u32 %s1145_s14, 4  ;;  %p1070_p2 = scmp.ne.s32.totalorder %s1410_s3, %s1069_s18  ;;  %s46_s15 = int_to_ptr.vmem [resolvable:$true] %s45_s15 }
  0x27   :  { %p1073_p3 = scmp.lt.u32.totalorder %s1069_s18, %s1410_s3 }
  0x29   :  { %p1075_p4 = pnand %p1073_p3, %p1070_p2 }
  0x2b   :  { %1078 = shalt.err (!%p1075_p4)
}
  0x2c   :  { %s1079_s23 = scalar_lea.vmem %s46_s15, 256  ;;  %p1084_p6 = scmp.lt.s32.totalorder %s46_s15, %s46_s15 }
  0x2d   :  { %p1080_p5 = scmp.ne.s32.totalorder %s46_s15, %s1079_s23  ;;  %p1085_p7 = scmp.lt.s32.totalorder %s1079_s23, %s1079_s23 }
  0x2f   :  { %p1086_p8 = por %p1085_p7, %p1084_p6 }
  0x31   :  { %p1087_p9 = pnand %p1086_p8, %p1080_p5 }
  0x33   :  { %1090 = shalt.err (!%p1087_p9)
}
  0x34   :  { %s1146_s1 = smov 64   ;;  %s1147_s12 = smov 4  }
  0x35   :  { %51 = dma.hbm_to_vmem [thread:$0]  %s1410_s3, 256, %s46_s15, [#allocation9], %s1146_s1, %s1146_s1, %s1147_s12  }
  0x36   :  { %s1148_s26 = smov [#allocation11]   ;;  %s1091_s30 = scalar_lea.hbm %s1411_s4, 16 }
  0x37   :  { %s58_s27 = sshll.u32 %s1148_s26, 4  ;;  %p1092_p10 = scmp.ne.s32.totalorder %s1411_s4, %s1091_s30  ;;  %s59_s27 = int_to_ptr.vmem [resolvable:$true] %s58_s27 }
  0x38   :  { %p1095_p11 = scmp.lt.u32.totalorder %s1091_s30, %s1411_s4 }
  0x3a   :  { %p1097_p12 = pnand %p1095_p11, %p1092_p10 }
  0x3c   :  { %1100 = shalt.err (!%p1097_p12)
}
  0x3d   :  { %s1101_s14 = scalar_lea.vmem %s59_s27, 16  ;;  %s1105_s3 = scalar_lea.vmem %s59_s27, 32 }
  0x3e   :  { %p1102_p13 = scmp.ne.s32.totalorder %s59_s27, %s1101_s14  ;;  %p1106_p0 = scmp.lt.s32.totalorder %s59_s27, %s59_s27 }
  0x3f   :  { %p1107_p1 = scmp.lt.s32.totalorder %s1105_s3, %s1101_s14 }
  0x41   :  { %p1108_p2 = por %p1107_p1, %p1106_p0 }
  0x43   :  { %p1109_p3 = pnand %p1108_p2, %p1102_p13 }
  0x45   :  { %1112 = shalt.err (!%p1109_p3)
}
  0x46   :  { %61 = dma.hbm_to_vmem [thread:$0]  %s1411_s4, 16, %s59_s27, [#allocation12]  }
  0x47   :  { %1135 = dma.done.wait [#allocation6], 16  }
  0x48   :  { %1136 = vsyncadd [#allocation6], 4294967280 }
  0x49   :  { %1137 = dma.done.wait [#allocation9], 272  }
  0x4a   :  { %1138 = vsyncadd [#allocation9], 4294967024 }
  0x4b   :  { %1139 = dma.done.wait [#allocation12], 16  }
  0x4c   :  { %1140 = vsyncadd [#allocation12], 4294967280  ;;  %vm96_vm0 = vcmask 261120   ;;  %v1258_v0 = vld [vmem:[%s1407_s0] sm:$0xff]  ;;  %v1263_v1 = vld [vmem:[%s1407_s0 + $0x8] sm:$0xff]  ;;  %v1149_v15 = vmov 0.0  }
  0x4d   :  { %v97_v2 = vsel %vm96_vm0, %v1258_v0, 0.0  ;;  %v199_v3 = vsel %vm96_vm0, %v1263_v1, 0.0  ;;  %v1001_v14 = vld [vmem:[#allocation10] sm:$0xff]   ;;  %901 = vmatprep.subr.bf16.mxu0 %v1149_v15  ;;  %909 = vmatprep.subr.bf16.mxu1 %v1149_v15  ;;  %v1002_v16 = vld [vmem:[#allocation10 + $0x8] sm:$0xff]   ;;  %vm1150_vm1 = vmmov 0   ;;  %v1301_v36 = vld [vmem:[%s1414_s7 + $0x8] sm:$0xff]  }
  0x4e   :  { %98 = vadd.xlane.f32.xlu0 %v97_v2  ;;  %902 = vmatpush3.bf16.msra.mxu0 %v1001_v14  ;;  %v842_v24 = vld [vmem:[#allocation5] ss:$0 sm:$0xff]  ;;  %v843_v26 = vld [vmem:[#allocation8] ss:$0 sm:$0xff]  ;;  %v1292_v35 = vld [vmem:[%s1414_s7] sm:$0xff]   ;;  %s1151_s23 = smov 96  }
  0x4f   :  { %910 = vmatpush3.bf16.msra.mxu1 %v1001_v14  ;;  %903 = vmatprep.subr.bf16.mxu0 %v1149_v15  ;;  %v844_v37 = vld [vmem:[#allocation11] ss:$0 sm:$0xff]  ;;  %v94_v61 = vld [vmem:[%s1415_s8] sm:$0x3]  ;;  %vm391_vm2 = vcmask 1041408   ;;  %vm387_vm3 = vcmask 31744  }
  0x50   :  { %905 = vmatprep.mubr.msk.bf16.mxu0 %vm1150_vm1, %v1149_v15  ;;  %911 = vmatprep.subr.bf16.mxu1 %v1149_v15  ;;  %v1326_v62 = vsel %vm391_vm2, %v94_v61, 0  ;;  %s1152_s11 = smov [#allocation13]  }
  0x51   :  { %913 = vmatprep.mubr.msk.bf16.mxu1 %vm1150_vm1, %v1149_v15  ;;  %s828_s13 = sshll.u32 %s1152_s11, 4  ;;  %s829_s13 = int_to_ptr.vmem [resolvable:$true] %s828_s13 }
  0x52   :  { %200 = vadd.xlane.f32.xlu0 %v199_v3  ;;  %904 = vmatpush3.bf16.msra.mxu0 %v1002_v16  ;;  %p1118_p5 = scmp.lt.s32.totalorder %s829_s13, %s829_s13 }
  0x53   :  { %912 = vmatpush3.bf16.msra.mxu1 %v1002_v16  ;;  %917 = vmatprep.subr.bf16.mxu0 %v1149_v15 }
  0x54   :  { %925 = vmatprep.subr.bf16.mxu1 %v1149_v15 }
  0xdb   :  { %v99_v4 = vpop.xlane.xlu0 %98 }
  0xdc   :  { %v101_v5 = vmul.f32 0.03125, %v99_v4 }
  0xde   :  { %v102_v6 = vsub.f32 %v1258_v0, %v101_v5 }
  0xdf   :  { %v201_v7 = vpop.xlane.xlu0 %200 }
  0xe0   :  { %v202_v8 = vmul.f32 0.03125, %v201_v7  ;;  %v103_v9 = vmul.f32 %v102_v6, %v102_v6 }
  0xe2   :  { %v203_v10 = vsub.f32 %v1263_v1, %v202_v8  ;;  %v104_v11 = vsel %vm96_vm0, %v103_v9, 0.0 }
  0xe3   :  { %105 = vadd.xlane.f32.xlu1 %v104_v11 }
  0xe4   :  { %v204_v12 = vmul.f32 %v203_v10, %v203_v10 }
  0xe6   :  { %v205_v13 = vsel %vm96_vm0, %v204_v12, 0.0 }
  0xe7   :  { %206 = vadd.xlane.f32.xlu1 %v205_v13 }
 0x170   :  { %v106_v17 = vpop.xlane.xlu1 %105 }
 0x171   :  { %v107_v18 = vmul.f32 0.03125, %v106_v17 }
 0x173   :  { %v108_v19 = vadd.f32 1e-05, %v107_v18 }
 0x174   :  { %v207_v20 = vpop.xlane.xlu1 %206 }
 0x175   :  { %1009 = vrsqrt.f32 %v108_v19  ;;  %v208_v21 = vmul.f32 0.03125, %v207_v20 }
 0x177   :  { %v209_v22 = vadd.f32 1e-05, %v208_v21 }
 0x179   :  { %1011 = vrsqrt.f32 %v209_v22 }
 0x17f   :  { %v1010_v23 = vpop.eup %1009 }
 0x180   :  { %v110_v25 = vmul.f32 %v1010_v23, %v102_v6  ;;  %v1005_v23 = vld [vmem:[%s1412_s5] sm:$0xff]  }
 0x182   :  { %v117_v27 = vmul.f32 %v842_v24, %v110_v25 }
 0x183   :  { %v1012_v28 = vpop.eup %1011 }
 0x184   :  { %v124_v29 = vadd.f32 %v843_v26, %v117_v27  ;;  %v211_v30 = vmul.f32 %v1012_v28, %v203_v10 }
 0x186   :  { %v125_v31 = vpack.c.bf16 %v124_v29, %v124_v29  ;;  %v212_v32 = vmul.f32 %v842_v24, %v211_v30 }
 0x188   :  { %906 = vmatmul.mubr.msk.bf16.vlgmr.msra.gmra.mrb[0].mxu0 %vm96_vm0, %v125_v31  ;;  %v213_v33 = vadd.f32 %v843_v26, %v212_v32  ;;  %v1006_v26 = vld [vmem:[%s1412_s5 + $0x8] sm:$0xff]  }
 0x189   :  { %921 = vmatprep.mubr.msk.bf16.mxu0 %vm1150_vm1, %v1149_v15  ;;  %918 = vmatpush3.bf16.msra.mxu0 %v1292_v35 }
 0x18a   :  { %v214_v34 = vpack.c.bf16 %v213_v33, %v213_v33  ;;  %919 = vmatprep.subr.bf16.mxu0 %v1149_v15 }
 0x18c   :  { %914 = vmatmul.mubr.msk.bf16.vlgmr.msra.gmra.mrb[0].mxu1 %vm96_vm0, %v214_v34 }
 0x18d   :  { %929 = vmatprep.mubr.msk.bf16.mxu1 %vm1150_vm1, %v1149_v15  ;;  %926 = vmatpush3.bf16.msra.mxu1 %v1292_v35 }
 0x18e   :  { %927 = vmatprep.subr.bf16.mxu1 %v1149_v15  ;;  %920 = vmatpush3.bf16.msra.mxu0 %v1301_v36 }
 0x18f   :  { %933 = vmatprep.subr.bf16.mxu0 %v1149_v15 }
 0x191   :  { %928 = vmatpush3.bf16.msra.mxu1 %v1301_v36 }
 0x192   :  { %939 = vmatprep.subr.bf16.mxu1 %v1149_v15 }
 0x25b   :  { %v181_v38 = vpop.f32.mrb[0].mxu0 }
 0x25c   :  { %v182_v39 = vadd.f32 %v844_v37, %v181_v38  ;;  %v907_v40 = vpop.f32.mrb[1].mxu0 }
 0x25d   :  { %v184_v41 = vpop.f32.mrb[2].mxu0 }
 0x25e   :  { %187 = vst.msk [vmem:[#allocation2] sm:$0xff] %vm96_vm0, %v182_v39  ;;  %189 = vrot.lane.b32.xlu0 %v182_v39, %s1151_s23  ;;  %v908_v42 = vpop.f32.mrb[3].mxu0 }
 0x25f   :  { %v252_v43 = vpop.f32.mrb[0].mxu1 }
 0x260   :  { %v253_v44 = vadd.f32 %v844_v37, %v252_v43  ;;  %v915_v45 = vpop.f32.mrb[1].mxu1 }
 0x261   :  { %v255_v46 = vpop.f32.mrb[2].mxu1 }
 0x262   :  { %259 = vst.msk [vmem:[#allocation2 + $0x8] sm:$0xff] %vm96_vm0, %v253_v44  ;;  %261 = vrot.lane.b32.xlu1 %v253_v44, %s1151_s23  ;;  %v916_v47 = vpop.f32.mrb[3].mxu1 }
 0x265   :  { %v271_v51 = vld [vmem:[#allocation2] sm:$0xff] }
 0x266   :  { %193 = vrot.lane.b32.xlu1 %v182_v39, %s1146_s1 }
 0x269   :  { %v555_v57 = vld [vmem:[#allocation2 + $0x8] sm:$0xff] }
 0x26a   :  { %266 = vrot.lane.b32.xlu1 %v253_v44, %s1146_s1 }
 0x2d0   :  { %v190_v48 = vpop.permute.xlu0 %189 }
 0x2d1   :  { %192 = vst.msk [vmem:[#allocation3] sm:$0xff] %vm96_vm0, %v190_v48 }
 0x2d4   :  { %v262_v49 = vpop.permute.xlu1 %261 }
 0x2d5   :  { %265 = vst.msk [vmem:[#allocation3 + $0x8] sm:$0xff] %vm96_vm0, %v262_v49 }
 0x2d8   :  { %v194_v50 = vpop.permute.xlu1 %193  ;;  %v272_v52 = vld [vmem:[#allocation3] sm:$0xff] }
 0x2d9   :  { %196 = vst.msk [vmem:[#allocation4] sm:$0xff] %vm96_vm0, %v194_v50  ;;  %v273_v53 = vmul.f32 %v272_v52, %v271_v51  ;;  %v557_v24 = vmul.f32 %v555_v57, %v272_v52 }
 0x2db   :  { %v274_v54 = vpack.c.bf16 %v273_v53, %v273_v53  ;;  %v558_v25 = vpack.c.bf16 %v557_v24, %v557_v24 }
 0x2dc   :  { %v267_v55 = vpop.permute.xlu1 %266  ;;  %v330_v56 = vld [vmem:[#allocation3 + $0x8] sm:$0xff] }
 0x2dd   :  { %270 = vst.msk [vmem:[#allocation4 + $0x8] sm:$0xff] %vm96_vm0, %v267_v55  ;;  %922 = vmatmul.mubr.msk.bf16.vlgmr.msra.gmra.mrb[4].mxu0 %vm96_vm0, %v274_v54  ;;  %v331_v58 = vmul.f32 %v330_v56, %v271_v51  ;;  %v1316_v59 = vmul.f32 %v555_v57, %v330_v56 }
 0x2de   :  { %935 = vmatprep.mubr.msk.bf16.mxu0 %vm1150_vm1, %v1149_v15  ;;  %934 = vmatpush3.bf16.msra.mxu0 %v1326_v62 }
 0x2df   :  { %v332_v60 = vpack.c.bf16 %v331_v58, %v331_v58  ;;  %945 = vmatprep.subr.bf16.mxu0 %v1149_v15  ;;  %v604_v47 = vpack.c.bf16 %v1316_v59, %v1316_v59 }
 0x2e0   :  { %v1355_v28 = vld [vmem:[#allocation4] sm:$0xff] }
 0x2e1   :  { %930 = vmatmul.mubr.msk.bf16.vlgmr.msra.gmra.mrb[4].mxu1 %vm96_vm0, %v332_v60 }
 0x2e2   :  { %941 = vmatprep.mubr.msk.bf16.mxu1 %vm1150_vm1, %v1149_v15  ;;  %940 = vmatpush3.bf16.msra.mxu1 %v1326_v62 }
 0x2e3   :  { %953 = vmatprep.subr.bf16.mxu1 %v1149_v15 }
 0x2e4   :  { %v1357_v30 = vld [vmem:[#allocation4 + $0x8] sm:$0xff] }
 0x3b0   :  { %v324_v63 = vpop.f32.mrb[4].mxu0 }
 0x3b1   :  { %v923_v2 = vpop.f32.mrb[5].mxu0 }
 0x3b2   :  { %v327_v3 = vpop.f32.mrb[6].mxu0 }
 0x3b3   :  { %v924_v4 = vpop.f32.mrb[7].mxu0 }
 0x3b4   :  { %v370_v5 = vpop.f32.mrb[4].mxu1 }
 0x3b5   :  { %v376_v6 = vmax.f32 %v324_v63, %v370_v5  ;;  %v931_v7 = vpop.f32.mrb[5].mxu1 }
 0x3b6   :  { %v373_v8 = vpop.f32.mrb[6].mxu1 }
 0x3b7   :  { %v377_v9 = vsub.f32 %v324_v63, %v376_v6  ;;  %v380_v10 = vsub.f32 %v370_v5, %v376_v6  ;;  %v932_v11 = vpop.f32.mrb[7].mxu1  ;;  %v1007_v5 = vld [vmem:[%s1412_s5] sm:$0xff]   ;;  %v1008_v8 = vld [vmem:[%s1412_s5 + $0x8] sm:$0xff]   ;;  %s1113_s5 = scalar_lea.vmem %s829_s13, 256 }
 0x3b8   :  { %p1114_p4 = scmp.ne.s32.totalorder %s829_s13, %s1113_s5  ;;  %p1119_p6 = scmp.lt.s32.totalorder %s1113_s5, %s1113_s5 }
 0x3b9   :  { %v378_v12 = vmul.f32 1.442695, %v377_v9  ;;  %v381_v13 = vmul.f32 1.442695, %v380_v10 }
 0x3ba   :  { %p1120_p7 = por %p1119_p6, %p1118_p5 }
 0x3bb   :  { %1013 = vpow2.f32 %v378_v12 }
 0x3bc   :  { %1015 = vpow2.f32 %v381_v13  ;;  %p1121_p8 = pnand %p1120_p7, %p1114_p4 }
 0x3c5   :  { %v1014_v14 = vpop.eup %1013 }
 0x3c6   :  { %v1016_v16 = vpop.eup %1015 }
 0x3c7   :  { %v383_v17 = vadd.f32 %v1016_v16, %v1014_v14 }
 0x3c9   :  { %1017 = vrcp.f32 %v383_v17 }
 0x3d3   :  { %v1018_v18 = vpop.eup %1017 }
 0x3d4   :  { %v385_v19 = vmul.f32 %v1018_v18, %v1014_v14  ;;  %v437_v20 = vmul.f32 %v1018_v18, %v1016_v16 }
 0x3d6   :  { %v386_v21 = vpack.c.bf16 %v385_v19, %v385_v19  ;;  %v438_v22 = vpack.c.bf16 %v437_v20, %v437_v20 }
 0x3d8   :  { %936 = vmatmul.mubr.msk.bf16.vlgmr.msra.gmra.mrb[8].mxu0 %vm387_vm3, %v386_v21  ;;  %942 = vmatmul.mubr.msk.bf16.vlgmr.msra.gmra.mrb[8].mxu1 %vm387_vm3, %v438_v22 }
 0x3d9   :  { %954 = vmatpush3.bf16.msra.mxu1 %v1292_v35  ;;  %957 = vmatprep.mubr.msk.bf16.mxu1 %vm1150_vm1, %v1149_v15 }
 0x3da   :  { %955 = vmatprep.subr.bf16.mxu1 %v1149_v15  ;;  %946 = vmatpush3.bf16.msra.mxu0 %v1005_v23 }
 0x3db   :  { %947 = vmatprep.subr.bf16.mxu0 %v1149_v15  ;;  %949 = vmatprep.mubr.msk.bf16.mxu0 %vm1150_vm1, %v1149_v15 }
 0x3dd   :  { %956 = vmatpush3.bf16.msra.mxu1 %v1301_v36 }
 0x3de   :  { %969 = vmatprep.subr.bf16.mxu1 %v1149_v15  ;;  %948 = vmatpush3.bf16.msra.mxu0 %v1006_v26 }
 0x3df   :  { %961 = vmatprep.subr.bf16.mxu0 %v1149_v15 }
 0x3e0   :  { %958 = vmatmul.mubr.msk.bf16.vlgmr.msra.gmra.mrb[12].mxu1 %vm96_vm0, %v558_v25 }
 0x3e1   :  { %970 = vmatpush3.bf16.msra.mxu1 %v1326_v62  ;;  %971 = vmatprep.mubr.msk.bf16.mxu1 %vm1150_vm1, %v1149_v15 }
 0x3e2   :  { %981 = vmatprep.subr.bf16.mxu1 %v1149_v15 }
 0x4ab   :  { %v429_v27 = vpop.f32.mrb[8].mxu0  ;;  %v476_v29 = vpop.f32.mrb[8].mxu1 }
 0x4ac   :  { %v436_v31 = vmul.f32 %v1355_v28, %v429_v27  ;;  %v483_v32 = vmul.f32 %v1357_v30, %v476_v29  ;;  %v937_v33 = vpop.f32.mrb[9].mxu0  ;;  %v943_v34 = vpop.f32.mrb[9].mxu1 }
 0x4ad   :  { %v432_v37 = vpop.f32.mrb[10].mxu0  ;;  %v479_v38 = vpop.f32.mrb[10].mxu1 }
 0x4ae   :  { %v484_v39 = vadd.f32 %v483_v32, %v436_v31  ;;  %v938_v40 = vpop.f32.mrb[11].mxu0  ;;  %v944_v41 = vpop.f32.mrb[11].mxu1 }
 0x4b0   :  { %v485_v42 = vpack.c.bf16 %v484_v39, %v484_v39 }
 0x4b2   :  { %950 = vmatmul.mubr.msk.bf16.vlgmr.msra.gmra.mrb[12].mxu0 %vm96_vm0, %v485_v42 }
 0x4b3   :  { %962 = vmatpush3.bf16.msra.mxu0 %v1292_v35  ;;  %v596_v43 = vpop.f32.mrb[12].mxu1  ;;  %965 = vmatprep.mubr.msk.bf16.mxu0 %vm1150_vm1, %v1149_v15  ;;  %v856_v35 = vld [vmem:[%s1413_s6] ss:$0 sm:$0xff] }
 0x4b4   :  { %v959_v44 = vpop.f32.mrb[13].mxu1  ;;  %963 = vmatprep.subr.bf16.mxu0 %v1149_v15 }
 0x4b5   :  { %v599_v45 = vpop.f32.mrb[14].mxu1 }
 0x4b6   :  { %v960_v46 = vpop.f32.mrb[15].mxu1 }
 0x4b7   :  { %964 = vmatpush3.bf16.msra.mxu0 %v1301_v36 }
 0x4b8   :  { %975 = vmatprep.subr.bf16.mxu0 %v1149_v15 }
 0x4ba   :  { %966 = vmatmul.mubr.msk.bf16.vlgmr.msra.gmra.mrb[16].mxu0 %vm96_vm0, %v604_v47 }
 0x4bb   :  { %976 = vmatpush3.bf16.msra.mxu0 %v1326_v62  ;;  %977 = vmatprep.mubr.msk.bf16.mxu0 %vm1150_vm1, %v1149_v15 }
 0x585   :  { %v546_v48 = vpop.f32.mrb[12].mxu0 }
 0x586   :  { %v547_v49 = vadd.f32 %v856_v35, %v546_v48  ;;  %v951_v50 = vpop.f32.mrb[13].mxu0 }
 0x587   :  { %v549_v36 = vpop.f32.mrb[14].mxu0 }
 0x588   :  { %v553_v51 = vadd.f32 %v547_v49, %v1258_v0  ;;  %v952_v52 = vpop.f32.mrb[15].mxu0 }
 0x58a   :  { %554 = vst.msk [vmem:[#allocation13] sm:$0xff] %vm96_vm0, %v553_v51 }
 0x58d   :  { %v642_v53 = vpop.f32.mrb[16].mxu0 }
 0x58e   :  { %v648_v54 = vmax.f32 %v596_v43, %v642_v53  ;;  %v967_v55 = vpop.f32.mrb[17].mxu0 }
 0x58f   :  { %v645_v56 = vpop.f32.mrb[18].mxu0 }
 0x590   :  { %v649_v57 = vsub.f32 %v596_v43, %v648_v54  ;;  %v652_v58 = vsub.f32 %v642_v53, %v648_v54  ;;  %v968_v59 = vpop.f32.mrb[19].mxu0 }
 0x592   :  { %v650_v60 = vmul.f32 1.442695, %v649_v57  ;;  %v653_v61 = vmul.f32 1.442695, %v652_v58 }
 0x594   :  { %1019 = vpow2.f32 %v650_v60 }
 0x595   :  { %1021 = vpow2.f32 %v653_v61 }
 0x59e   :  { %v1020_v62 = vpop.eup %1019 }
 0x59f   :  { %v1022_v63 = vpop.eup %1021 }
 0x5a0   :  { %v655_v2 = vadd.f32 %v1022_v63, %v1020_v62 }
 0x5a2   :  { %1023 = vrcp.f32 %v655_v2 }
 0x5ac   :  { %v1024_v3 = vpop.eup %1023 }
 0x5ad   :  { %v657_v0 = vmul.f32 %v1024_v3, %v1020_v62  ;;  %v704_v4 = vmul.f32 %v1024_v3, %v1022_v63 }
 0x5af   :  { %v658_v6 = vpack.c.bf16 %v657_v0, %v657_v0  ;;  %v705_v7 = vpack.c.bf16 %v704_v4, %v704_v4 }
 0x5b1   :  { %972 = vmatmul.mubr.msk.bf16.vlgmr.msra.gmra.mrb[16].mxu1 %vm387_vm3, %v658_v6  ;;  %978 = vmatmul.mubr.msk.bf16.vlgmr.msra.gmra.mrb[20].mxu0 %vm387_vm3, %v705_v7 }
 0x5b2   :  { %982 = vmatpush3.bf16.msra.mxu1 %v1007_v5  ;;  %985 = vmatprep.mubr.msk.bf16.mxu1 %vm1150_vm1, %v1149_v15 }
 0x5b3   :  { %983 = vmatprep.subr.bf16.mxu1 %v1149_v15 }
 0x5b6   :  { %984 = vmatpush3.bf16.msra.mxu1 %v1008_v8 }
 0x684   :  { %v696_v9 = vpop.f32.mrb[16].mxu1  ;;  %v743_v10 = vpop.f32.mrb[20].mxu0 }
 0x685   :  { %v703_v11 = vmul.f32 %v696_v9, %v1355_v28  ;;  %v750_v12 = vmul.f32 %v743_v10, %v1357_v30  ;;  %v973_v13 = vpop.f32.mrb[17].mxu1  ;;  %v979_v14 = vpop.f32.mrb[21].mxu0 }
 0x686   :  { %v699_v16 = vpop.f32.mrb[18].mxu1  ;;  %v746_v17 = vpop.f32.mrb[22].mxu0 }
 0x687   :  { %v751_v18 = vadd.f32 %v750_v12, %v703_v11  ;;  %v974_v19 = vpop.f32.mrb[19].mxu1  ;;  %v980_v20 = vpop.f32.mrb[23].mxu0 }
 0x689   :  { %v752_v21 = vpack.c.bf16 %v751_v18, %v751_v18 }
 0x68b   :  { %986 = vmatmul.mubr.msk.bf16.vlgmr.msra.gmra.mrb[20].mxu1 %vm96_vm0, %v752_v21 }
 0x75e   :  { %v813_v15 = vpop.f32.mrb[20].mxu1 }
 0x75f   :  { %v814_v22 = vadd.f32 %v856_v35, %v813_v15  ;;  %v987_v23 = vpop.f32.mrb[21].mxu1 }
 0x760   :  { %v816_v24 = vpop.f32.mrb[22].mxu1 }
 0x761   :  { %v820_v25 = vadd.f32 %v1263_v1, %v814_v22  ;;  %v988_v26 = vpop.f32.mrb[23].mxu1 }
 0x763   :  { %822 = vst.msk [vmem:[#allocation13 + $0x8] sm:$0xff] %vm96_vm0, %v820_v25 }
 0x764   :  { %1124 = shalt.err (!%p1121_p8)
}
 0x765   :  { %s1125_s14 = scalar_lea.hbm %s1416_s9, 256 }
 0x766   :  { %p1126_p9 = scmp.ne.s32.totalorder %s1416_s9, %s1125_s14  ;;  %p1129_p10 = scmp.lt.u32.totalorder %s1125_s14, %s1416_s9 }
 0x768   :  { %p1131_p11 = pnand %p1129_p10, %p1126_p9 }
 0x76a   :  { %1134 = shalt.err (!%p1131_p11)
}
 0x76b   :  { %s1153_s18 = smov 128   ;;  %s1154_s19 = smov 8  }
 0x76c   :  { %834 = dma.vmem_to_hbm [thread:$0]  %s829_s13, 256, %s1416_s9, [#allocation7], %s1153_s18, %s1153_s18, %s1154_s19  }
 0x76d   :  { %1141 = dma.done.wait [#allocation7], 256  }
 0x76e   :  { %1142 = vsyncadd [#allocation7], 4294967040 }
 0x76f   :  { %838 = vsyncpa [#allocation6], 1 }
 0x770   :  { %839 = vsyncpa [#allocation9], 1 }
 0x771   :  { %840 = vsyncpa [#allocation12], 1 }
 0x772   :  { %841 = vsyncpa [#allocation7], 1 }

// kernel: tpu_custom_call.1
= control target key start
LH: loop header
LB: loop body
LE: loop exit
PB: predicated region body
PF: predicated region fallthrough
CT: control target
= control target key end

     0   :  { %14 = vsyncpa [#allocation6], 0  ;;  %s1407_s0 = inlined_call_operand.vmem [shape: f32[2,8,32], index: 0, kind: input, shape index: {}]   ;;  %s1408_s1 = inlined_call_operand.hbm [shape: f32[1,32], index: 1, kind: input, shape index: {}]   ;;  %s1409_s2 = inlined_call_operand.hbm [shape: f32[1,32], index: 2, kind: input, shape index: {}]   ;;  %s1410_s3 = inlined_call_operand.hbm [shape: bf16[32,96], index: 3, kind: input, shape index: {}]   ;;  %s1411_s4 = inlined_call_operand.hbm [shape: f32[1,96], index: 4, kind: input, shape index: {}]   ;;  %s1412_s5 = inlined_call_operand.vmem [shape: bf16[32,32], index: 5, kind: input, shape index: {}]   ;;  %s1413_s6 = inlined_call_operand.vmem [shape: f32[1,32], index: 6, kind: input, shape index: {}]   ;;  %s1414_s7 = inlined_call_operand.vmem [shape: bf16[32,4], index: 7, kind: input, shape index: {}]   ;;  %s1415_s8 = inlined_call_operand.vmem [shape: bf16[4,32], index: 8, kind: input, shape index: {}]   ;;  %s1416_s9 = inlined_call_operand.hbm [shape: f32[2,8,32], index: 9, kind: output, shape index: {}]  }
   0x1   :  { %15 = vsyncpa [#allocation9], 0 }
   0x2   :  { %16 = vsyncpa [#allocation12], 0 }
   0x3   :  { %17 = vsyncpa [#allocation7], 0  ;;  %s1143_s30 = smov [#allocation8]   ;;  %s1144_s11 = smov [#allocation5]  }
   0x4   :  { %s36_s10 = sshll.u32 %s1143_s30, 4  ;;  %s26_s12 = sshll.u32 %s1144_s11, 4  ;;  %s37_s10 = int_to_ptr.vmem [resolvable:$true] %s36_s10  ;;  %s27_s12 = int_to_ptr.vmem [resolvable:$true] %s26_s12 }
   0x5   :  { %s1025_s15 = scalar_lea.hbm %s1409_s2, 16 }
   0x6   :  { %p1026_p0 = scmp.ne.s32.totalorder %s1409_s2, %s1025_s15  ;;  %p1029_p1 = scmp.lt.u32.totalorder %s1025_s15, %s1409_s2 }
   0x8   :  { %p1031_p2 = pnand %p1029_p1, %p1026_p0 }
   0xa   :  { %1034 = shalt.err (!%p1031_p2)
}
   0xb   :  { %s1035_s20 = scalar_lea.vmem %s37_s10, 16  ;;  %s1039_s21 = scalar_lea.vmem %s37_s10, 32 }
   0xc   :  { %p1036_p3 = scmp.ne.s32.totalorder %s37_s10, %s1035_s20  ;;  %p1040_p4 = scmp.lt.s32.totalorder %s37_s10, %s37_s10 }
   0xd   :  { %p1041_p5 = scmp.lt.s32.totalorder %s1039_s21, %s1035_s20 }
   0xf   :  { %p1042_p6 = por %p1041_p5, %p1040_p4 }
  0x11   :  { %p1043_p7 = pnand %p1042_p6, %p1036_p3 }
  0x13   :  { %1046 = shalt.err (!%p1043_p7)
}
  0x14   :  { %39 = dma.hbm_to_vmem [thread:$0]  %s1409_s2, 16, %s37_s10, [#allocation9]  }
  0x15   :  { %s1047_s26 = scalar_lea.hbm %s1408_s1, 16 }
  0x16   :  { %p1048_p8 = scmp.ne.s32.totalorder %s1408_s1, %s1047_s26  ;;  %p1051_p9 = scmp.lt.u32.totalorder %s1047_s26, %s1408_s1 }
  0x18   :  { %p1053_p10 = pnand %p1051_p9, %p1048_p8 }
  0x1a   :  { %1056 = shalt.err (!%p1053_p10)
}
  0x1b   :  { %s1057_s11 = scalar_lea.vmem %s27_s12, 16  ;;  %s1061_s13 = scalar_lea.vmem %s27_s12, 32 }
  0x1c   :  { %p1058_p11 = scmp.ne.s32.totalorder %s27_s12, %s1057_s11  ;;  %p1062_p12 = scmp.lt.s32.totalorder %s27_s12, %s27_s12 }
  0x1d   :  { %p1063_p13 = scmp.lt.s32.totalorder %s1061_s13, %s1057_s11 }
  0x1f   :  { %p1064_p0 = por %p1063_p13, %p1062_p12 }
  0x21   :  { %p1065_p1 = pnand %p1064_p0, %p1058_p11 }
  0x23   :  { %1068 = shalt.err (!%p1065_p1)
}
  0x24   :  { %29 = dma.hbm_to_vmem [thread:$0]  %s1408_s1, 16, %s27_s12, [#allocation6]  }
  0x25   :  { %s1145_s14 = smov [#allocation10]   ;;  %s1069_s18 = scalar_lea.hbm %s1410_s3, 256 }
  0x26   :  { %s45_s15 = sshll.u32 %s1145_s14, 4  ;;  %p1070_p2 = scmp.ne.s32.totalorder %s1410_s3, %s1069_s18  ;;  %s46_s15 = int_to_ptr.vmem [resolvable:$true] %s45_s15 }
  0x27   :  { %p1073_p3 = scmp.lt.u32.totalorder %s1069_s18, %s1410_s3 }
  0x29   :  { %p1075_p4 = pnand %p1073_p3, %p1070_p2 }
  0x2b   :  { %1078 = shalt.err (!%p1075_p4)
}
  0x2c   :  { %s1079_s23 = scalar_lea.vmem %s46_s15, 256  ;;  %p1084_p6 = scmp.lt.s32.totalorder %s46_s15, %s46_s15 }
  0x2d   :  { %p1080_p5 = scmp.ne.s32.totalorder %s46_s15, %s1079_s23  ;;  %p1085_p7 = scmp.lt.s32.totalorder %s1079_s23, %s1079_s23 }
  0x2f   :  { %p1086_p8 = por %p1085_p7, %p1084_p6 }
  0x31   :  { %p1087_p9 = pnand %p1086_p8, %p1080_p5 }
  0x33   :  { %1090 = shalt.err (!%p1087_p9)
}
  0x34   :  { %s1146_s1 = smov 64   ;;  %s1147_s12 = smov 4  }
  0x35   :  { %51 = dma.hbm_to_vmem [thread:$0]  %s1410_s3, 256, %s46_s15, [#allocation9], %s1146_s1, %s1146_s1, %s1147_s12  }
  0x36   :  { %s1148_s26 = smov [#allocation11]   ;;  %s1091_s30 = scalar_lea.hbm %s1411_s4, 16 }
  0x37   :  { %s58_s27 = sshll.u32 %s1148_s26, 4  ;;  %p1092_p10 = scmp.ne.s32.totalorder %s1411_s4, %s1091_s30  ;;  %s59_s27 = int_to_ptr.vmem [resolvable:$true] %s58_s27 }
  0x38   :  { %p1095_p11 = scmp.lt.u32.totalorder %s1091_s30, %s1411_s4 }
  0x3a   :  { %p1097_p12 = pnand %p1095_p11, %p1092_p10 }
  0x3c   :  { %1100 = shalt.err (!%p1097_p12)
}
  0x3d   :  { %s1101_s14 = scalar_lea.vmem %s59_s27, 16  ;;  %s1105_s3 = scalar_lea.vmem %s59_s27, 32 }
  0x3e   :  { %p1102_p13 = scmp.ne.s32.totalorder %s59_s27, %s1101_s14  ;;  %p1106_p0 = scmp.lt.s32.totalorder %s59_s27, %s59_s27 }
  0x3f   :  { %p1107_p1 = scmp.lt.s32.totalorder %s1105_s3, %s1101_s14 }
  0x41   :  { %p1108_p2 = por %p1107_p1, %p1106_p0 }
  0x43   :  { %p1109_p3 = pnand %p1108_p2, %p1102_p13 }
  0x45   :  { %1112 = shalt.err (!%p1109_p3)
}
  0x46   :  { %61 = dma.hbm_to_vmem [thread:$0]  %s1411_s4, 16, %s59_s27, [#allocation12]  }
  0x47   :  { %1135 = dma.done.wait [#allocation6], 16  }
  0x48   :  { %1136 = vsyncadd [#allocation6], 4294967280 }
  0x49   :  { %1137 = dma.done.wait [#allocation9], 272  }
  0x4a   :  { %1138 = vsyncadd [#allocation9], 4294967024 }
  0x4b   :  { %1139 = dma.done.wait [#allocation12], 16  }
  0x4c   :  { %1140 = vsyncadd [#allocation12], 4294967280  ;;  %vm96_vm0 = vcmask 261120   ;;  %v1258_v0 = vld [vmem:[%s1407_s0] sm:$0xff]  ;;  %v1263_v1 = vld [vmem:[%s1407_s0 + $0x8] sm:$0xff]  ;;  %v1149_v15 = vmov 0.0  }
  0x4d   :  { %v97_v2 = vsel %vm96_vm0, %v1258_v0, 0.0  ;;  %v199_v3 = vsel %vm96_vm0, %v1263_v1, 0.0  ;;  %v1001_v14 = vld [vmem:[#allocation10] sm:$0xff]   ;;  %901 = vmatprep.subr.bf16.mxu0 %v1149_v15  ;;  %909 = vmatprep.subr.bf16.mxu1 %v1149_v15  ;;  %v1002_v16 = vld [vmem:[#allocation10 + $0x8] sm:$0xff]   ;;  %vm1150_vm1 = vmmov 0   ;;  %v1301_v36 = vld [vmem:[%s1414_s7 + $0x8] sm:$0xff]  }
  0x4e   :  { %98 = vadd.xlane.f32.xlu0 %v97_v2  ;;  %902 = vmatpush3.bf16.msra.mxu0 %v1001_v14  ;;  %v842_v24 = vld [vmem:[#allocation5] ss:$0 sm:$0xff]  ;;  %v843_v26 = vld [vmem:[#allocation8] ss:$0 sm:$0xff]  ;;  %v1292_v35 = vld [vmem:[%s1414_s7] sm:$0xff]   ;;  %s1151_s23 = smov 96  }
  0x4f   :  { %910 = vmatpush3.bf16.msra.mxu1 %v1001_v14  ;;  %903 = vmatprep.subr.bf16.mxu0 %v1149_v15  ;;  %v844_v37 = vld [vmem:[#allocation11] ss:$0 sm:$0xff]  ;;  %v94_v61 = vld [vmem:[%s1415_s8] sm:$0x3]  ;;  %vm391_vm2 = vcmask 1041408   ;;  %vm387_vm3 = vcmask 31744  }
  0x50   :  { %905 = vmatprep.mubr.msk.bf16.mxu0 %vm1150_vm1, %v1149_v15  ;;  %911 = vmatprep.subr.bf16.mxu1 %v1149_v15  ;;  %v1326_v62 = vsel %vm391_vm2, %v94_v61, 0  ;;  %s1152_s11 = smov [#allocation13]  }
  0x51   :  { %913 = vmatprep.mubr.msk.bf16.mxu1 %vm1150_vm1, %v1149_v15  ;;  %s828_s13 = sshll.u32 %s1152_s11, 4  ;;  %s829_s13 = int_to_ptr.vmem [resolvable:$true] %s828_s13 }
  0x52   :  { %200 = vadd.xlane.f32.xlu0 %v199_v3  ;;  %904 = vmatpush3.bf16.msra.mxu0 %v1002_v16  ;;  %p1118_p5 = scmp.lt.s32.totalorder %s829_s13, %s829_s13 }
  0x53   :  { %912 = vmatpush3.bf16.msra.mxu1 %v1002_v16  ;;  %917 = vmatprep.subr.bf16.mxu0 %v1149_v15 }
  0x54   :  { %925 = vmatprep.subr.bf16.mxu1 %v1149_v15 }
  0xdb   :  { %v99_v4 = vpop.xlane.xlu0 %98 }
  0xdc   :  { %v101_v5 = vmul.f32 0.03125, %v99_v4 }
  0xde   :  { %v102_v6 = vsub.f32 %v1258_v0, %v101_v5 }
  0xdf   :  { %v201_v7 = vpop.xlane.xlu0 %200 }
  0xe0   :  { %v202_v8 = vmul.f32 0.03125, %v201_v7  ;;  %v103_v9 = vmul.f32 %v102_v6, %v102_v6 }
  0xe2   :  { %v203_v10 = vsub.f32 %v1263_v1, %v202_v8  ;;  %v104_v11 = vsel %vm96_vm0, %v103_v9, 0.0 }
  0xe3   :  { %105 = vadd.xlane.f32.xlu1 %v104_v11 }
  0xe4   :  { %v204_v12 = vmul.f32 %v203_v10, %v203_v10 }
  0xe6   :  { %v205_v13 = vsel %vm96_vm0, %v204_v12, 0.0 }
  0xe7   :  { %206 = vadd.xlane.f32.xlu1 %v205_v13 }
 0x170   :  { %v106_v17 = vpop.xlane.xlu1 %105 }
 0x171   :  { %v107_v18 = vmul.f32 0.03125, %v106_v17 }
 0x173   :  { %v108_v19 = vadd.f32 1e-05, %v107_v18 }
 0x174   :  { %v207_v20 = vpop.xlane.xlu1 %206 }
 0x175   :  { %1009 = vrsqrt.f32 %v108_v19  ;;  %v208_v21 = vmul.f32 0.03125, %v207_v20 }
 0x177   :  { %v209_v22 = vadd.f32 1e-05, %v208_v21 }
 0x179   :  { %1011 = vrsqrt.f32 %v209_v22 }
 0x17f   :  { %v1010_v23 = vpop.eup %1009 }
 0x180   :  { %v110_v25 = vmul.f32 %v1010_v23, %v102_v6  ;;  %v1005_v23 = vld [vmem:[%s1412_s5] sm:$0xff]  }
 0x182   :  { %v117_v27 = vmul.f32 %v842_v24, %v110_v25 }
 0x183   :  { %v1012_v28 = vpop.eup %1011 }
 0x184   :  { %v124_v29 = vadd.f32 %v843_v26, %v117_v27  ;;  %v211_v30 = vmul.f32 %v1012_v28, %v203_v10 }
 0x186   :  { %v125_v31 = vpack.c.bf16 %v124_v29, %v124_v29  ;;  %v212_v32 = vmul.f32 %v842_v24, %v211_v30 }
 0x188   :  { %906 = vmatmul.mubr.msk.bf16.vlgmr.msra.gmra.mrb[0].mxu0 %vm96_vm0, %v125_v31  ;;  %v213_v33 = vadd.f32 %v843_v26, %v212_v32  ;;  %v1006_v26 = vld [vmem:[%s1412_s5 + $0x8] sm:$0xff]  }
 0x189   :  { %921 = vmatprep.mubr.msk.bf16.mxu0 %vm1150_vm1, %v1149_v15  ;;  %918 = vmatpush3.bf16.msra.mxu0 %v1292_v35 }
 0x18a   :  { %v214_v34 = vpack.c.bf16 %v213_v33, %v213_v33  ;;  %919 = vmatprep.subr.bf16.mxu0 %v1149_v15 }
 0x18c   :  { %914 = vmatmul.mubr.msk.bf16.vlgmr.msra.gmra.mrb[0].mxu1 %vm96_vm0, %v214_v34 }
 0x18d   :  { %929 = vmatprep.mubr.msk.bf16.mxu1 %vm1150_vm1, %v1149_v15  ;;  %926 = vmatpush3.bf16.msra.mxu1 %v1292_v35 }
 0x18e   :  { %927 = vmatprep.subr.bf16.mxu1 %v1149_v15  ;;  %920 = vmatpush3.bf16.msra.mxu0 %v1301_v36 }
 0x18f   :  { %933 = vmatprep.subr.bf16.mxu0 %v1149_v15 }
 0x191   :  { %928 = vmatpush3.bf16.msra.mxu1 %v1301_v36 }
 0x192   :  { %939 = vmatprep.subr.bf16.mxu1 %v1149_v15 }
 0x25b   :  { %v181_v38 = vpop.f32.mrb[0].mxu0 }
 0x25c   :  { %v182_v39 = vadd.f32 %v844_v37, %v181_v38  ;;  %v907_v40 = vpop.f32.mrb[1].mxu0 }
 0x25d   :  { %v184_v41 = vpop.f32.mrb[2].mxu0 }
 0x25e   :  { %187 = vst.msk [vmem:[#allocation2] sm:$0xff] %vm96_vm0, %v182_v39  ;;  %189 = vrot.lane.b32.xlu0 %v182_v39, %s1151_s23  ;;  %v908_v42 = vpop.f32.mrb[3].mxu0 }
 0x25f   :  { %v252_v43 = vpop.f32.mrb[0].mxu1 }
 0x260   :  { %v253_v44 = vadd.f32 %v844_v37, %v252_v43  ;;  %v915_v45 = vpop.f32.mrb[1].mxu1 }
 0x261   :  { %v255_v46 = vpop.f32.mrb[2].mxu1 }
 0x262   :  { %259 = vst.msk [vmem:[#allocation2 + $0x8] sm:$0xff] %vm96_vm0, %v253_v44  ;;  %261 = vrot.lane.b32.xlu1 %v253_v44, %s1151_s23  ;;  %v916_v47 = vpop.f32.mrb[3].mxu1 }
 0x265   :  { %v271_v51 = vld [vmem:[#allocation2] sm:$0xff] }
 0x266   :  { %193 = vrot.lane.b32.xlu1 %v182_v39, %s1146_s1 }
 0x269   :  { %v555_v57 = vld [vmem:[#allocation2 + $0x8] sm:$0xff] }
 0x26a   :  { %266 = vrot.lane.b32.xlu1 %v253_v44, %s1146_s1 }
 0x2d0   :  { %v190_v48 = vpop.permute.xlu0 %189 }
 0x2d1   :  { %192 = vst.msk [vmem:[#allocation3] sm:$0xff] %vm96_vm0, %v190_v48 }
 0x2d4   :  { %v262_v49 = vpop.permute.xlu1 %261 }
 0x2d5   :  { %265 = vst.msk [vmem:[#allocation3 + $0x8] sm:$0xff] %vm96_vm0, %v262_v49 }
 0x2d8   :  { %v194_v50 = vpop.permute.xlu1 %193  ;;  %v272_v52 = vld [vmem:[#allocation3] sm:$0xff] }
 0x2d9   :  { %196 = vst.msk [vmem:[#allocation4] sm:$0xff] %vm96_vm0, %v194_v50  ;;  %v273_v53 = vmul.f32 %v272_v52, %v271_v51  ;;  %v557_v24 = vmul.f32 %v555_v57, %v272_v52 }
 0x2db   :  { %v274_v54 = vpack.c.bf16 %v273_v53, %v273_v53  ;;  %v558_v25 = vpack.c.bf16 %v557_v24, %v557_v24 }
 0x2dc   :  { %v267_v55 = vpop.permute.xlu1 %266  ;;  %v330_v56 = vld [vmem:[#allocation3 + $0x8] sm:$0xff] }
 0x2dd   :  { %270 = vst.msk [vmem:[#allocation4 + $0x8] sm:$0xff] %vm96_vm0, %v267_v55  ;;  %922 = vmatmul.mubr.msk.bf16.vlgmr.msra.gmra.mrb[4].mxu0 %vm96_vm0, %v274_v54  ;;  %v331_v58 = vmul.f32 %v330_v56, %v271_v51  ;;  %v1316_v59 = vmul.f32 %v555_v57, %v330_v56 }
 0x2de   :  { %935 = vmatprep.mubr.msk.bf16.mxu0 %vm1150_vm1, %v1149_v15  ;;  %934 = vmatpush3.bf16.msra.mxu0 %v1326_v62 }
 0x2df   :  { %v332_v60 = vpack.c.bf16 %v331_v58, %v331_v58  ;;  %945 = vmatprep.subr.bf16.mxu0 %v1149_v15  ;;  %v604_v47 = vpack.c.bf16 %v1316_v59, %v1316_v59 }
 0x2e0   :  { %v1355_v28 = vld [vmem:[#allocation4] sm:$0xff] }
 0x2e1   :  { %930 = vmatmul.mubr.msk.bf16.vlgmr.msra.gmra.mrb[4].mxu1 %vm96_vm0, %v332_v60 }
 0x2e2   :  { %941 = vmatprep.mubr.msk.bf16.mxu1 %vm1150_vm1, %v1149_v15  ;;  %940 = vmatpush3.bf16.msra.mxu1 %v1326_v62 }
 0x2e3   :  { %953 = vmatprep.subr.bf16.mxu1 %v1149_v15 }
 0x2e4   :  { %v1357_v30 = vld [vmem:[#allocation4 + $0x8] sm:$0xff] }
 0x3b0   :  { %v324_v63 = vpop.f32.mrb[4].mxu0 }
 0x3b1   :  { %v923_v2 = vpop.f32.mrb[5].mxu0 }
 0x3b2   :  { %v327_v3 = vpop.f32.mrb[6].mxu0 }
 0x3b3   :  { %v924_v4 = vpop.f32.mrb[7].mxu0 }
 0x3b4   :  { %v370_v5 = vpop.f32.mrb[4].mxu1 }
 0x3b5   :  { %v376_v6 = vmax.f32 %v324_v63, %v370_v5  ;;  %v931_v7 = vpop.f32.mrb[5].mxu1 }
 0x3b6   :  { %v373_v8 = vpop.f32.mrb[6].mxu1 }
 0x3b7   :  { %v377_v9 = vsub.f32 %v324_v63, %v376_v6  ;;  %v380_v10 = vsub.f32 %v370_v5, %v376_v6  ;;  %v932_v11 = vpop.f32.mrb[7].mxu1  ;;  %v1007_v5 = vld [vmem:[%s1412_s5] sm:$0xff]   ;;  %v1008_v8 = vld [vmem:[%s1412_s5 + $0x8] sm:$0xff]   ;;  %s1113_s5 = scalar_lea.vmem %s829_s13, 256 }
 0x3b8   :  { %p1114_p4 = scmp.ne.s32.totalorder %s829_s13, %s1113_s5  ;;  %p1119_p6 = scmp.lt.s32.totalorder %s1113_s5, %s1113_s5 }
 0x3b9   :  { %v378_v12 = vmul.f32 1.442695, %v377_v9  ;;  %v381_v13 = vmul.f32 1.442695, %v380_v10 }
 0x3ba   :  { %p1120_p7 = por %p1119_p6, %p1118_p5 }
 0x3bb   :  { %1013 = vpow2.f32 %v378_v12 }
 0x3bc   :  { %1015 = vpow2.f32 %v381_v13  ;;  %p1121_p8 = pnand %p1120_p7, %p1114_p4 }
 0x3c5   :  { %v1014_v14 = vpop.eup %1013 }
 0x3c6   :  { %v1016_v16 = vpop.eup %1015 }
 0x3c7   :  { %v383_v17 = vadd.f32 %v1016_v16, %v1014_v14 }
 0x3c9   :  { %1017 = vrcp.f32 %v383_v17 }
 0x3d3   :  { %v1018_v18 = vpop.eup %1017 }
 0x3d4   :  { %v385_v19 = vmul.f32 %v1018_v18, %v1014_v14  ;;  %v437_v20 = vmul.f32 %v1018_v18, %v1016_v16 }
 0x3d6   :  { %v386_v21 = vpack.c.bf16 %v385_v19, %v385_v19  ;;  %v438_v22 = vpack.c.bf16 %v437_v20, %v437_v20 }
 0x3d8   :  { %936 = vmatmul.mubr.msk.bf16.vlgmr.msra.gmra.mrb[8].mxu0 %vm387_vm3, %v386_v21  ;;  %942 = vmatmul.mubr.msk.bf16.vlgmr.msra.gmra.mrb[8].mxu1 %vm387_vm3, %v438_v22 }
 0x3d9   :  { %954 = vmatpush3.bf16.msra.mxu1 %v1292_v35  ;;  %957 = vmatprep.mubr.msk.bf16.mxu1 %vm1150_vm1, %v1149_v15 }
 0x3da   :  { %955 = vmatprep.subr.bf16.mxu1 %v1149_v15  ;;  %946 = vmatpush3.bf16.msra.mxu0 %v1005_v23 }
 0x3db   :  { %947 = vmatprep.subr.bf16.mxu0 %v1149_v15  ;;  %949 = vmatprep.mubr.msk.bf16.mxu0 %vm1150_vm1, %v1149_v15 }
 0x3dd   :  { %956 = vmatpush3.bf16.msra.mxu1 %v1301_v36 }
 0x3de   :  { %969 = vmatprep.subr.bf16.mxu1 %v1149_v15  ;;  %948 = vmatpush3.bf16.msra.mxu0 %v1006_v26 }
 0x3df   :  { %961 = vmatprep.subr.bf16.mxu0 %v1149_v15 }
 0x3e0   :  { %958 = vmatmul.mubr.msk.bf16.vlgmr.msra.gmra.mrb[12].mxu1 %vm96_vm0, %v558_v25 }
 0x3e1   :  { %970 = vmatpush3.bf16.msra.mxu1 %v1326_v62  ;;  %971 = vmatprep.mubr.msk.bf16.mxu1 %vm1150_vm1, %v1149_v15 }
 0x3e2   :  { %981 = vmatprep.subr.bf16.mxu1 %v1149_v15 }
 0x4ab   :  { %v429_v27 = vpop.f32.mrb[8].mxu0  ;;  %v476_v29 = vpop.f32.mrb[8].mxu1 }
 0x4ac   :  { %v436_v31 = vmul.f32 %v1355_v28, %v429_v27  ;;  %v483_v32 = vmul.f32 %v1357_v30, %v476_v29  ;;  %v937_v33 = vpop.f32.mrb[9].mxu0  ;;  %v943_v34 = vpop.f32.mrb[9].mxu1 }
 0x4ad   :  { %v432_v37 = vpop.f32.mrb[10].mxu0  ;;  %v479_v38 = vpop.f32.mrb[10].mxu1 }
 0x4ae   :  { %v484_v39 = vadd.f32 %v483_v32, %v436_v31  ;;  %v938_v40 = vpop.f32.mrb[11].mxu0  ;;  %v944_v41 = vpop.f32.mrb[11].mxu1 }
 0x4b0   :  { %v485_v42 = vpack.c.bf16 %v484_v39, %v484_v39 }
 0x4b2   :  { %950 = vmatmul.mubr.msk.bf16.vlgmr.msra.gmra.mrb[12].mxu0 %vm96_vm0, %v485_v42 }
 0x4b3   :  { %962 = vmatpush3.bf16.msra.mxu0 %v1292_v35  ;;  %v596_v43 = vpop.f32.mrb[12].mxu1  ;;  %965 = vmatprep.mubr.msk.bf16.mxu0 %vm1150_vm1, %v1149_v15  ;;  %v856_v35 = vld [vmem:[%s1413_s6] ss:$0 sm:$0xff] }
 0x4b4   :  { %v959_v44 = vpop.f32.mrb[13].mxu1  ;;  %963 = vmatprep.subr.bf16.mxu0 %v1149_v15 }
 0x4b5   :  { %v599_v45 = vpop.f32.mrb[14].mxu1 }
 0x4b6   :  { %v960_v46 = vpop.f32.mrb[15].mxu1 }
 0x4b7   :  { %964 = vmatpush3.bf16.msra.mxu0 %v1301_v36 }
 0x4b8   :  { %975 = vmatprep.subr.bf16.mxu0 %v1149_v15 }
 0x4ba   :  { %966 = vmatmul.mubr.msk.bf16.vlgmr.msra.gmra.mrb[16].mxu0 %vm96_vm0, %v604_v47 }
 0x4bb   :  { %976 = vmatpush3.bf16.msra.mxu0 %v1326_v62  ;;  %977 = vmatprep.mubr.msk.bf16.mxu0 %vm1150_vm1, %v1149_v15 }
 0x585   :  { %v546_v48 = vpop.f32.mrb[12].mxu0 }
 0x586   :  { %v547_v49 = vadd.f32 %v856_v35, %v546_v48  ;;  %v951_v50 = vpop.f32.mrb[13].mxu0 }
 0x587   :  { %v549_v36 = vpop.f32.mrb[14].mxu0 }
 0x588   :  { %v553_v51 = vadd.f32 %v547_v49, %v1258_v0  ;;  %v952_v52 = vpop.f32.mrb[15].mxu0 }
 0x58a   :  { %554 = vst.msk [vmem:[#allocation13] sm:$0xff] %vm96_vm0, %v553_v51 }
 0x58d   :  { %v642_v53 = vpop.f32.mrb[16].mxu0 }
 0x58e   :  { %v648_v54 = vmax.f32 %v596_v43, %v642_v53  ;;  %v967_v55 = vpop.f32.mrb[17].mxu0 }
 0x58f   :  { %v645_v56 = vpop.f32.mrb[18].mxu0 }
 0x590   :  { %v649_v57 = vsub.f32 %v596_v43, %v648_v54  ;;  %v652_v58 = vsub.f32 %v642_v53, %v648_v54  ;;  %v968_v59 = vpop.f32.mrb[19].mxu0 }
 0x592   :  { %v650_v60 = vmul.f32 1.442695, %v649_v57  ;;  %v653_v61 = vmul.f32 1.442695, %v652_v58 }
 0x594   :  { %1019 = vpow2.f32 %v650_v60 }
 0x595   :  { %1021 = vpow2.f32 %v653_v61 }
 0x59e   :  { %v1020_v62 = vpop.eup %1019 }
 0x59f   :  { %v1022_v63 = vpop.eup %1021 }
 0x5a0   :  { %v655_v2 = vadd.f32 %v1022_v63, %v1020_v62 }
 0x5a2   :  { %1023 = vrcp.f32 %v655_v2 }
 0x5ac   :  { %v1024_v3 = vpop.eup %1023 }
 0x5ad   :  { %v657_v0 = vmul.f32 %v1024_v3, %v1020_v62  ;;  %v704_v4 = vmul.f32 %v1024_v3, %v1022_v63 }
 0x5af   :  { %v658_v6 = vpack.c.bf16 %v657_v0, %v657_v0  ;;  %v705_v7 = vpack.c.bf16 %v704_v4, %v704_v4 }
 0x5b1   :  { %972 = vmatmul.mubr.msk.bf16.vlgmr.msra.gmra.mrb[16].mxu1 %vm387_vm3, %v658_v6  ;;  %978 = vmatmul.mubr.msk.bf16.vlgmr.msra.gmra.mrb[20].mxu0 %vm387_vm3, %v705_v7 }
 0x5b2   :  { %982 = vmatpush3.bf16.msra.mxu1 %v1007_v5  ;;  %985 = vmatprep.mubr.msk.bf16.mxu1 %vm1150_vm1, %v1149_v15 }
 0x5b3   :  { %983 = vmatprep.subr.bf16.mxu1 %v1149_v15 }
 0x5b6   :  { %984 = vmatpush3.bf16.msra.mxu1 %v1008_v8 }
 0x684   :  { %v696_v9 = vpop.f32.mrb[16].mxu1  ;;  %v743_v10 = vpop.f32.mrb[20].mxu0 }
 0x685   :  { %v703_v11 = vmul.f32 %v696_v9, %v1355_v28  ;;  %v750_v12 = vmul.f32 %v743_v10, %v1357_v30  ;;  %v973_v13 = vpop.f32.mrb[17].mxu1  ;;  %v979_v14 = vpop.f32.mrb[21].mxu0 }
 0x686   :  { %v699_v16 = vpop.f32.mrb[18].mxu1  ;;  %v746_v17 = vpop.f32.mrb[22].mxu0 }
 0x687   :  { %v751_v18 = vadd.f32 %v750_v12, %v703_v11  ;;  %v974_v19 = vpop.f32.mrb[19].mxu1  ;;  %v980_v20 = vpop.f32.mrb[23].mxu0 }
 0x689   :  { %v752_v21 = vpack.c.bf16 %v751_v18, %v751_v18 }
 0x68b   :  { %986 = vmatmul.mubr.msk.bf16.vlgmr.msra.gmra.mrb[20].mxu1 %vm96_vm0, %v752_v21 }
 0x75e   :  { %v813_v15 = vpop.f32.mrb[20].mxu1 }
 0x75f   :  { %v814_v22 = vadd.f32 %v856_v35, %v813_v15  ;;  %v987_v23 = vpop.f32.mrb[21].mxu1 }
 0x760   :  { %v816_v24 = vpop.f32.mrb[22].mxu1 }
 0x761   :  { %v820_v25 = vadd.f32 %v1263_v1, %v814_v22  ;;  %v988_v26 = vpop.f32.mrb[23].mxu1 }
 0x763   :  { %822 = vst.msk [vmem:[#allocation13 + $0x8] sm:$0xff] %vm96_vm0, %v820_v25 }
 0x764   :  { %1124 = shalt.err (!%p1121_p8)
}
 0x765   :  { %s1125_s14 = scalar_lea.hbm %s1416_s9, 256 }
 0x766   :  { %p1126_p9 = scmp.ne.s32.totalorder %s1416_s9, %s1125_s14  ;;  %p1129_p10 = scmp.lt.u32.totalorder %s1125_s14, %s1416_s9 }
 0x768   :  { %p1131_p11 = pnand %p1129_p10, %p1126_p9 }
 0x76a   :  { %1134 = shalt.err (!%p1131_p11)
}
 0x76b   :  { %s1153_s18 = smov 128   ;;  %s1154_s19 = smov 8  }
 0x76c   :  { %834 = dma.vmem_to_hbm [thread:$0]  %s829_s13, 256, %s1416_s9, [#allocation7], %s1153_s18, %s1153_s18, %s1154_s19  }
 0x76d   :  { %1141 = dma.done.wait [#allocation7], 256  }
 0x76e   :  { %1142 = vsyncadd [#allocation7], 4294967040 }
 0x76f   :  { %838 = vsyncpa [#allocation6], 1 }
 0x770   :  { %839 = vsyncpa [#allocation9], 1 }
 0x771   :  { %840 = vsyncpa [#allocation12], 1 }
 0x772   :  { %841 = vsyncpa [#allocation7], 1 }

</bundles_post_ra>
